<compile_context>
chip_gen: v7x
topology: tpu7x:2x2x1
jax: 0.10.0
libtpu: 0.0.40
codegen_flags: <defaults>
</compile_context>

<pallas_src>
import functools
import math

import jax
import jax.numpy as jnp
from jax.experimental import pallas as pl
from jax.experimental.pallas import tpu as pltpu

MXU_DTYPE = jnp.bfloat16  # operand dtype at MXU boundaries (f32 accumulation)


def _mxu_dot(a, b):
    """Matmul on the MXU: bf16 operands, f32 accumulation."""
    return jnp.dot(a.astype(MXU_DTYPE), b.astype(MXU_DTYPE),
                   preferred_element_type=jnp.float32)


# -----------------------------------------------------------------------------
# Fused multi-head-attention block kernel:
#   LayerNorm( x_q + MHA(x_q, x_kv, x_kv, mask) )   -- one pallas_call
# -----------------------------------------------------------------------------
def _mha_ln_kernel(*refs, B, Tq, Tk, H, dh, scale, eps, use_mask):
    if use_mask:
        (xq_ref, xkv_ref, wq_ref, bq_ref, wkv_ref, bkv_ref,
         wo_ref, bo_ref, mask_ref, g_ref, beta_ref, o_ref) = refs
    else:
        (xq_ref, xkv_ref, wq_ref, bq_ref, wkv_ref, bkv_ref,
         wo_ref, bo_ref, g_ref, beta_ref, o_ref) = refs

    D = H * dh
    xq = xq_ref[...]                                     # (B*Tq, D) f32
    xkv = xkv_ref[...]                                   # (B*Tk, D) f32

    # fused projections: Q (D->D) and K|V (D->2D) in two MXU matmuls
    q = _mxu_dot(xq, wq_ref[...]) + bq_ref[...]          # (B*Tq, D)
    kv = _mxu_dot(xkv, wkv_ref[...]) + bkv_ref[...]      # (B*Tk, 2D)

    q3 = q.reshape(B, Tq, D)
    k3 = kv[:, :D].reshape(B, Tk, D)
    v3 = kv[:, D:].reshape(B, Tk, D)

    if use_mask:
        mask_b = mask_ref[...][None, :, :] > 0           # (1, Tq, Tk)

    # all (batch, head) pairs processed in this single kernel invocation;
    # the output projection is folded in per-head:  ctx @ Wo == sum_h ctx_h @ Wo[h]
    attn_out = jnp.zeros((B * Tq, D), jnp.float32)
    for h in range(H):
        lo, hi = h * dh, (h + 1) * dh
        qh = q3[:, :, lo:hi]                             # (B, Tq, dh)
        kh = k3[:, :, lo:hi]                             # (B, Tk, dh)
        vh = v3[:, :, lo:hi]                             # (B, Tk, dh)

        s = jnp.einsum("bqd,bkd->bqk",
                       qh.astype(MXU_DTYPE), kh.astype(MXU_DTYPE),
                       preferred_element_type=jnp.float32) * scale   # (B, Tq, Tk)
        if use_mask:
            s = jnp.where(mask_b, s, -1e9)               # masked_fill(mask == 0, -1e9)

        m = jnp.max(s, axis=-1, keepdims=True)
        p = jnp.exp(s - m)                               # f32 softmax (v5e-friendly)
        p = p * pl.reciprocal(jnp.sum(p, axis=-1, keepdims=True), approx=True)

        ctx_h = jnp.einsum("bqk,bkd->bqd",
                           p.astype(MXU_DTYPE), vh.astype(MXU_DTYPE),
                           preferred_element_type=jnp.float32)        # (B, Tq, dh)
        attn_out = attn_out + _mxu_dot(ctx_h.reshape(B * Tq, dh),
                                       wo_ref[lo:hi, :])              # (B*Tq, D)
    attn_out = attn_out + bo_ref[...]

    # residual add + LayerNorm (biased variance, torch semantics), f32 stats
    hres = xq + attn_out
    mu = jnp.mean(hres, axis=-1, keepdims=True)
    var = jnp.mean(jnp.square(hres - mu), axis=-1, keepdims=True)
    o_ref[...] = (hres - mu) * jax.lax.rsqrt(var + eps) * g_ref[...] + beta_ref[...]


def mha_block(x_q, x_kv, p, mask, ln_g, ln_b, num_heads, eps=1e-5):
    """Fused LayerNorm(x_q + MHA(x_q, x_kv, x_kv, mask)). x_q:(B,Tq,D), x_kv:(B,Tk,D)."""
    B, Tq, D = x_q.shape
    Tk = x_kv.shape[1]
    dh = D // num_heads
    use_mask = mask is not None

    args = [
        x_q.reshape(B * Tq, D),
        x_kv.reshape(B * Tk, D),
        p["wq"], p["bq"].reshape(1, D),
        p["wkv"], p["bkv"].reshape(1, 2 * D),
        p["wo"], p["bo"].reshape(1, D),
    ]
    if use_mask:
        args.append(mask.astype(jnp.float32))            # 2-D mask, loaded once
    args += [ln_g.reshape(1, D), ln_b.reshape(1, D)]

    out = pl.pallas_call(
        functools.partial(_mha_ln_kernel, B=B, Tq=Tq, Tk=Tk, H=num_heads,
                          dh=dh, scale=1.0 / math.sqrt(dh), eps=eps,
                          use_mask=use_mask),
        out_shape=jax.ShapeDtypeStruct((B * Tq, D), jnp.float32),
    )(*args)
    return out.reshape(B, Tq, D)


# -----------------------------------------------------------------------------
# Fused position-wise FFN block kernel:
#   LayerNorm( x + W2 @ relu(W1 @ x + b1) + b2 )  -- intermediate kept in VMEM
# -----------------------------------------------------------------------------
def _ffn_ln_kernel(x_ref, w1_ref, b1_ref, w2_ref, b2_ref, g_ref, beta_ref, o_ref, *, eps):
    x = x_ref[...]                                       # (B*T, D)
    h = jnp.maximum(_mxu_dot(x, w1_ref[...]) + b1_ref[...], 0.0)   # (B*T, d_ff)
    y = _mxu_dot(h, w2_ref[...]) + b2_ref[...]                     # (B*T, D)
    hres = x + y
    mu = jnp.mean(hres, axis=-1, keepdims=True)
    var = jnp.mean(jnp.square(hres - mu), axis=-1, keepdims=True)
    o_ref[...] = (hres - mu) * jax.lax.rsqrt(var + eps) * g_ref[...] + beta_ref[...]


def ffn_block(x, p, eps=1e-5):
    B, T, D = x.shape
    d_ff = p["ff_w1"].shape[1]
    out = pl.pallas_call(
        functools.partial(_ffn_ln_kernel, eps=eps),
        out_shape=jax.ShapeDtypeStruct((B * T, D), jnp.float32),
    )(
        x.reshape(B * T, D),
        p["ff_w1"], p["ff_b1"].reshape(1, d_ff),
        p["ff_w2"], p["ff_b2"].reshape(1, D),
        p["ln3_g"].reshape(1, D), p["ln3_b"].reshape(1, D),
    )
    return out.reshape(B, T, D)


# -----------------------------------------------------------------------------
# Tiled, pipelined linear (used for the output projection; scales to large N/K)
# -----------------------------------------------------------------------------
def _linear_kernel(x_ref, w_ref, b_ref, o_ref, acc_ref, *, relu):
    @pl.when(pl.program_id(2) == 0)
    def _():
        acc_ref[...] = jnp.zeros_like(acc_ref)

    acc_ref[...] += _mxu_dot(x_ref[...], w_ref[...])

    @pl.when(pl.program_id(2) == pl.num_programs(2) - 1)
    def _():
        y = acc_ref[...] + b_ref[...]
        if relu:
            y = jnp.maximum(y, 0.0)
        o_ref[...] = y.astype(o_ref.dtype)


def _pick_tile(dim, max_tile, align):
    """Full extent when small; else the largest aligned divisor <= max_tile."""
    if dim <= max_tile:
        return dim
    t = (max_tile // align) * align
    while t >= align:
        if dim % t == 0:
            return t
        t -= align
    return dim


def linear(x2d, w, b, relu=False, tm_max=256, tn_max=512, tk_max=512):
    """y = x2d @ w + b, tiled matmul with f32 VMEM accumulator."""
    M, K = x2d.shape
    N = w.shape[1]
    tm = _pick_tile(M, tm_max, 8)
    tn = _pick_tile(N, tn_max, 128)
    tk = _pick_tile(K, tk_max, 128)
    grid = (M // tm, N // tn, K // tk)
    return pl.pallas_call(
        functools.partial(_linear_kernel, relu=relu),
        out_shape=jax.ShapeDtypeStruct((M, N), jnp.float32),
        grid_spec=pltpu.PrefetchScalarGridSpec(
            num_scalar_prefetch=0,
            grid=grid,
            in_specs=[
                pl.BlockSpec((tm, tk), lambda i, j, k: (i, k)),
                pl.BlockSpec((tk, tn), lambda i, j, k: (k, j)),
                pl.BlockSpec((1, tn), lambda i, j, k: (0, j)),
            ],
            out_specs=pl.BlockSpec((tm, tn), lambda i, j, k: (i, j)),
            scratch_shapes=[pltpu.VMEM((tm, tn), jnp.float32)],
        ),
        compiler_params=pltpu.CompilerParams(
            dimension_semantics=("parallel", "parallel", "arbitrary"),
            vmem_limit_bytes=32 * 1024 * 1024,
        ),
    )(x2d, w, b.reshape(1, N))


def output_projection(x2d, w, b):
    """Final projection with the vocab (lane) dim padded to a multiple of 128."""
    V = w.shape[1]
    Vp = ((V + 127) // 128) * 128
    if Vp != V:
        w = jnp.pad(w, ((0, 0), (0, Vp - V)))
        b = jnp.pad(b, (0, Vp - V))
    y = linear(x2d, w, b)
    return y[:, :V]


# -----------------------------------------------------------------------------
# Model glue (plain JAX, jitted)
# -----------------------------------------------------------------------------
def decoder_layer(p, x, enc_out, src_mask, tgt_mask, num_heads):
    # self attention + residual + norm1   (one fused pallas_call)
    x = mha_block(x, x, p["self_attn"], tgt_mask, p["ln1_g"], p["ln1_b"], num_heads)
    # encoder-decoder attention + residual + norm2   (one fused pallas_call)
    x = mha_block(x, enc_out, p["enc_dec_attn"], src_mask, p["ln2_g"], p["ln2_b"], num_heads)
    # position-wise feed-forward + residual + norm3   (one fused pallas_call)
    x = ffn_block(x, p)
    return x


@functools.partial(jax.jit, static_argnames=("num_heads",))
def decoder_forward(params, tgt, encoder_output, src_mask=None, tgt_mask=None, num_heads=4):
    B, T = tgt.shape
    D = params["embedding"].shape[1]
    x = params["embedding"][tgt] * math.sqrt(D)          # embedding lookup * sqrt(d_model)
    x = x + params["pos_encoding"][:T][None, :, :]       # positional encoding (dropout = identity)
    for lp in params["layers"]:
        x = decoder_layer(lp, x, encoder_output, src_mask, tgt_mask, num_heads)
    logits = output_projection(x.reshape(B * T, D), params["w_out"], params["b_out"])
    return logits.reshape(B, T, -1)


# -----------------------------------------------------------------------------
# Deterministic parameter construction (K|V projection stored pre-fused)
# -----------------------------------------------------------------------------
def make_params(key, num_layers, d_model, d_ff, vocab_size, max_len):
    def nrm(k, shape, scale=0.02):
        return (scale * jax.random.normal(k, shape)).astype(jnp.float32)

    keys = iter(jax.random.split(key, 4 + num_layers * 8))

    def mha_params():
        return {
            "wq": nrm(next(keys), (d_model, d_model)),
            "bq": jnp.zeros((d_model,), jnp.float32),
            "wkv": nrm(next(keys), (d_model, 2 * d_model)),     # fused [Wk | Wv]
            "bkv": jnp.zeros((2 * d_model,), jnp.float32),
            "wo": nrm(next(keys), (d_model, d_model)),
            "bo": jnp.zeros((d_model,), jnp.float32),
        }

    layers = []
    for _ in range(num_layers):
        layers.append({
            "self_attn": mha_params(),
            "enc_dec_attn": mha_params(),
            "ff_w1": nrm(next(keys), (d_model, d_ff)), "ff_b1": jnp.zeros((d_ff,), jnp.float32),
            "ff_w2": nrm(next(keys), (d_ff, d_model)), "ff_b2": jnp.zeros((d_model,), jnp.float32),
            "ln1_g": jnp.ones((d_model,), jnp.float32), "ln1_b": jnp.zeros((d_model,), jnp.float32),
            "ln2_g": jnp.ones((d_model,), jnp.float32), "ln2_b": jnp.zeros((d_model,), jnp.float32),
            "ln3_g": jnp.ones((d_model,), jnp.float32), "ln3_b": jnp.zeros((d_model,), jnp.float32),
        })

    # sinusoidal positional encoding table
    pos = jnp.arange(max_len, dtype=jnp.float32)[:, None]
    div = jnp.exp(jnp.arange(0, d_model, 2, dtype=jnp.float32) * (-math.log(10000.0) / d_model))
    pe = jnp.zeros((max_len, d_model), jnp.float32)
    pe = pe.at[:, 0::2].set(jnp.sin(pos * div))
    pe = pe.at[:, 1::2].set(jnp.cos(pos * div))

    return {
        "embedding": nrm(next(keys), (vocab_size, d_model), scale=1.0),
        "pos_encoding": pe,
        "layers": layers,
        "w_out": nrm(next(keys), (d_model, vocab_size)),
        "b_out": jnp.zeros((vocab_size,), jnp.float32),
    }


# -----------------------------------------------------------------------------
# Main
# -----------------------------------------------------------------------------
if __name__ == "__main__":
    num_layers = 2
    d_model = 32
    num_heads = 4
    d_ff = 64
    vocab_size = 50
    max_len = 64
    B, T_tgt, T_src = 2, 8, 8

    key = jax.random.PRNGKey(0)
    k_par, k_tgt, k_enc = jax.random.split(key, 3)

    params = make_params(k_par, num_layers, d_model, d_ff, vocab_size, max_len)
    tgt = jax.random.randint(k_tgt, (B, T_tgt), 0, vocab_size, dtype=jnp.int32)
    encoder_output = jax.random.normal(k_enc, (B, T_src, d_model), dtype=jnp.float32)

    # causal target mask (Tq, Tq); src_mask = None (all visible, no mask work at all)
    tgt_mask = jnp.tril(jnp.ones((T_tgt, T_tgt), jnp.float32))

    out = decoder_forward(params, tgt, encoder_output, src_mask=None,
                          tgt_mask=tgt_mask, num_heads=num_heads)
    out = jax.block_until_ready(out)

    assert out.shape == (B, T_tgt, vocab_size)
    assert bool(jnp.all(jnp.isfinite(out)))
    print("KERNEL_OK")
</pallas_src>

<mosaic_0001>
module attributes {stable_mosaic.version = 11 : i64} {
  func.func @_mha_ln_kernel(%arg0: memref<16x32xf32, #tpu.memory_space<vmem>>, %arg1: memref<16x32xf32, #tpu.memory_space<vmem>>, %arg2: memref<32x32xf32, #tpu.memory_space<vmem>>, %arg3: memref<1x32xf32, #tpu.memory_space<vmem>>, %arg4: memref<32x64xf32, #tpu.memory_space<vmem>>, %arg5: memref<1x64xf32, #tpu.memory_space<vmem>>, %arg6: memref<32x32xf32, #tpu.memory_space<vmem>>, %arg7: memref<1x32xf32, #tpu.memory_space<vmem>>, %arg8: memref<1x32xf32, #tpu.memory_space<vmem>>, %arg9: memref<1x32xf32, #tpu.memory_space<vmem>>, %arg10: memref<16x32xf32, #tpu.memory_space<vmem>>) attributes {dimension_semantics = [], scalar_prefetch = 0 : i64, scratch_operands = 0 : i64, tpu.core_type = #tpu.core_type<tc>} {
    %c0 = arith.constant 0 : index
    %c0_0 = arith.constant 0 : index
    %0 = vector.load %arg0[%c0, %c0_0] : memref<16x32xf32, #tpu.memory_space<vmem>>, vector<16x32xf32>
    %c0_1 = arith.constant 0 : index
    %c0_2 = arith.constant 0 : index
    %1 = vector.load %arg1[%c0_1, %c0_2] : memref<16x32xf32, #tpu.memory_space<vmem>>, vector<16x32xf32>
    %c0_3 = arith.constant 0 : index
    %c0_4 = arith.constant 0 : index
    %2 = vector.load %arg2[%c0_3, %c0_4] : memref<32x32xf32, #tpu.memory_space<vmem>>, vector<32x32xf32>
    %3 = arith.truncf %0 : vector<16x32xf32> to vector<16x32xbf16>
    %4 = arith.truncf %2 : vector<32x32xf32> to vector<32x32xbf16>
    %cst = arith.constant dense<0.000000e+00> : vector<16x32xf32>
    %5 = tpu.matmul %3, %4, %cst {dimension_numbers = #tpu.dot_dimension_numbers<[1], [0], [0], [1], [0, 0, 1, 1], [], []>} : vector<16x32xbf16>, vector<32x32xbf16>, vector<16x32xf32> -> vector<16x32xf32>
    %c0_5 = arith.constant 0 : index
    %c0_6 = arith.constant 0 : index
    %6 = vector.load %arg3[%c0_5, %c0_6] : memref<1x32xf32, #tpu.memory_space<vmem>>, vector<1x32xf32>
    %7 = vector.broadcast %6 : vector<1x32xf32> to vector<16x32xf32>
    %8 = arith.addf %5, %7 : vector<16x32xf32>
    %c0_7 = arith.constant 0 : index
    %c0_8 = arith.constant 0 : index
    %9 = vector.load %arg4[%c0_7, %c0_8] : memref<32x64xf32, #tpu.memory_space<vmem>>, vector<32x64xf32>
    %10 = arith.truncf %1 : vector<16x32xf32> to vector<16x32xbf16>
    %11 = arith.truncf %9 : vector<32x64xf32> to vector<32x64xbf16>
    %cst_9 = arith.constant dense<0.000000e+00> : vector<16x64xf32>
    %12 = tpu.matmul %10, %11, %cst_9 {dimension_numbers = #tpu.dot_dimension_numbers<[1], [0], [0], [1], [0, 0, 1, 1], [], []>} : vector<16x32xbf16>, vector<32x64xbf16>, vector<16x64xf32> -> vector<16x64xf32>
    %c0_10 = arith.constant 0 : index
    %c0_11 = arith.constant 0 : index
    %13 = vector.load %arg5[%c0_10, %c0_11] : memref<1x64xf32, #tpu.memory_space<vmem>>, vector<1x64xf32>
    %14 = vector.broadcast %13 : vector<1x64xf32> to vector<16x64xf32>
    %15 = arith.addf %12, %14 : vector<16x64xf32>
    %16 = vector.shape_cast %8 : vector<16x32xf32> to vector<2x8x32xf32>
    %17 = vector.extract_strided_slice %15 {offsets = [0, 0], sizes = [16, 32], strides = [1, 1]} : vector<16x64xf32> to vector<16x32xf32>
    %18 = vector.shape_cast %17 : vector<16x32xf32> to vector<2x8x32xf32>
    %19 = vector.extract_strided_slice %15 {offsets = [0, 32], sizes = [16, 32], strides = [1, 1]} : vector<16x64xf32> to vector<16x32xf32>
    %20 = vector.shape_cast %19 : vector<16x32xf32> to vector<2x8x32xf32>
    %cst_12 = arith.constant 0.000000e+00 : f32
    %21 = vector.broadcast %cst_12 : f32 to vector<16x32xf32>
    %22 = vector.extract_strided_slice %16 {offsets = [0, 0, 0], sizes = [2, 8, 8], strides = [1, 1, 1]} : vector<2x8x32xf32> to vector<2x8x8xf32>
    %23 = vector.extract_strided_slice %18 {offsets = [0, 0, 0], sizes = [2, 8, 8], strides = [1, 1, 1]} : vector<2x8x32xf32> to vector<2x8x8xf32>
    %24 = vector.extract_strided_slice %20 {offsets = [0, 0, 0], sizes = [2, 8, 8], strides = [1, 1, 1]} : vector<2x8x32xf32> to vector<2x8x8xf32>
    %25 = arith.truncf %22 : vector<2x8x8xf32> to vector<2x8x8xbf16>
    %26 = arith.truncf %23 : vector<2x8x8xf32> to vector<2x8x8xbf16>
    "tpu.trace_start"() <{level = 10 : i32, message = "bqd,bkd->bqk"}> : () -> ()
    %cst_13 = arith.constant dense<0.000000e+00> : vector<2x8x8xf32>
    %27 = tpu.matmul %25, %26, %cst_13 {dimension_numbers = #tpu.dot_dimension_numbers<[2], [2], [1], [1], [0, 0, 0, 1, 1, 1], [0], [0]>} : vector<2x8x8xbf16>, vector<2x8x8xbf16>, vector<2x8x8xf32> -> vector<2x8x8xf32>
    "tpu.trace_stop"() : () -> ()
    %cst_14 = arith.constant 0.353553385 : f32
    %28 = vector.broadcast %cst_14 : f32 to vector<2x8x8xf32>
    %29 = arith.mulf %27, %28 : vector<2x8x8xf32>
    %cst_15 = arith.constant dense<0xFF800000> : vector<2x8xf32>
    %30 = vector.multi_reduction <maximumf>, %29, %cst_15 [2] : vector<2x8x8xf32> to vector<2x8xf32>
    %31 = vector.shape_cast %30 : vector<2x8xf32> to vector<2x8x1xf32>
    %32 = vector.broadcast %31 : vector<2x8x1xf32> to vector<2x8x8xf32>
    %33 = arith.subf %29, %32 : vector<2x8x8xf32>
    %34 = math.exp %33 : vector<2x8x8xf32>
    %cst_16 = arith.constant dense<0.000000e+00> : vector<2x8xf32>
    %35 = vector.multi_reduction <add>, %34, %cst_16 [2] : vector<2x8x8xf32> to vector<2x8xf32>
    %36 = vector.shape_cast %35 : vector<2x8xf32> to vector<2x8x1xf32>
    %37 = tpu.reciprocal %36 {approx = true} : vector<2x8x1xf32> -> vector<2x8x1xf32>
    %38 = vector.broadcast %37 : vector<2x8x1xf32> to vector<2x8x8xf32>
    %39 = arith.mulf %34, %38 : vector<2x8x8xf32>
    %40 = arith.truncf %39 : vector<2x8x8xf32> to vector<2x8x8xbf16>
    %41 = arith.truncf %24 : vector<2x8x8xf32> to vector<2x8x8xbf16>
    "tpu.trace_start"() <{level = 10 : i32, message = "bqk,bkd->bqd"}> : () -> ()
    %cst_17 = arith.constant dense<0.000000e+00> : vector<2x8x8xf32>
    %42 = tpu.matmul %40, %41, %cst_17 {dimension_numbers = #tpu.dot_dimension_numbers<[2], [1], [1], [2], [0, 0, 0, 1, 1, 2], [0], [0]>} : vector<2x8x8xbf16>, vector<2x8x8xbf16>, vector<2x8x8xf32> -> vector<2x8x8xf32>
    "tpu.trace_stop"() : () -> ()
    %43 = vector.shape_cast %42 : vector<2x8x8xf32> to vector<16x8xf32>
    %c0_18 = arith.constant 0 : index
    %c0_19 = arith.constant 0 : index
    %44 = vector.load %arg6[%c0_18, %c0_19] : memref<32x32xf32, #tpu.memory_space<vmem>>, vector<8x32xf32>
    %45 = arith.truncf %43 : vector<16x8xf32> to vector<16x8xbf16>
    %46 = arith.truncf %44 : vector<8x32xf32> to vector<8x32xbf16>
    %cst_20 = arith.constant dense<0.000000e+00> : vector<16x32xf32>
    %47 = tpu.matmul %45, %46, %cst_20 {dimension_numbers = #tpu.dot_dimension_numbers<[1], [0], [0], [1], [0, 0, 1, 1], [], []>} : vector<16x8xbf16>, vector<8x32xbf16>, vector<16x32xf32> -> vector<16x32xf32>
    %48 = arith.addf %21, %47 : vector<16x32xf32>
    %49 = vector.extract_strided_slice %16 {offsets = [0, 0, 8], sizes = [2, 8, 8], strides = [1, 1, 1]} : vector<2x8x32xf32> to vector<2x8x8xf32>
    %50 = vector.extract_strided_slice %18 {offsets = [0, 0, 8], sizes = [2, 8, 8], strides = [1, 1, 1]} : vector<2x8x32xf32> to vector<2x8x8xf32>
    %51 = vector.extract_strided_slice %20 {offsets = [0, 0, 8], sizes = [2, 8, 8], strides = [1, 1, 1]} : vector<2x8x32xf32> to vector<2x8x8xf32>
    %52 = arith.truncf %49 : vector<2x8x8xf32> to vector<2x8x8xbf16>
    %53 = arith.truncf %50 : vector<2x8x8xf32> to vector<2x8x8xbf16>
    "tpu.trace_start"() <{level = 10 : i32, message = "bqd,bkd->bqk"}> : () -> ()
    %cst_21 = arith.constant dense<0.000000e+00> : vector<2x8x8xf32>
    %54 = tpu.matmul %52, %53, %cst_21 {dimension_numbers = #tpu.dot_dimension_numbers<[2], [2], [1], [1], [0, 0, 0, 1, 1, 1], [0], [0]>} : vector<2x8x8xbf16>, vector<2x8x8xbf16>, vector<2x8x8xf32> -> vector<2x8x8xf32>
    "tpu.trace_stop"() : () -> ()
    %cst_22 = arith.constant 0.353553385 : f32
    %55 = vector.broadcast %cst_22 : f32 to vector<2x8x8xf32>
    %56 = arith.mulf %54, %55 : vector<2x8x8xf32>
    %cst_23 = arith.constant dense<0xFF800000> : vector<2x8xf32>
    %57 = vector.multi_reduction <maximumf>, %56, %cst_23 [2] : vector<2x8x8xf32> to vector<2x8xf32>
    %58 = vector.shape_cast %57 : vector<2x8xf32> to vector<2x8x1xf32>
    %59 = vector.broadcast %58 : vector<2x8x1xf32> to vector<2x8x8xf32>
    %60 = arith.subf %56, %59 : vector<2x8x8xf32>
    %61 = math.exp %60 : vector<2x8x8xf32>
    %cst_24 = arith.constant dense<0.000000e+00> : vector<2x8xf32>
    %62 = vector.multi_reduction <add>, %61, %cst_24 [2] : vector<2x8x8xf32> to vector<2x8xf32>
    %63 = vector.shape_cast %62 : vector<2x8xf32> to vector<2x8x1xf32>
    %64 = tpu.reciprocal %63 {approx = true} : vector<2x8x1xf32> -> vector<2x8x1xf32>
    %65 = vector.broadcast %64 : vector<2x8x1xf32> to vector<2x8x8xf32>
    %66 = arith.mulf %61, %65 : vector<2x8x8xf32>
    %67 = arith.truncf %66 : vector<2x8x8xf32> to vector<2x8x8xbf16>
    %68 = arith.truncf %51 : vector<2x8x8xf32> to vector<2x8x8xbf16>
    "tpu.trace_start"() <{level = 10 : i32, message = "bqk,bkd->bqd"}> : () -> ()
    %cst_25 = arith.constant dense<0.000000e+00> : vector<2x8x8xf32>
    %69 = tpu.matmul %67, %68, %cst_25 {dimension_numbers = #tpu.dot_dimension_numbers<[2], [1], [1], [2], [0, 0, 0, 1, 1, 2], [0], [0]>} : vector<2x8x8xbf16>, vector<2x8x8xbf16>, vector<2x8x8xf32> -> vector<2x8x8xf32>
    "tpu.trace_stop"() : () -> ()
    %70 = vector.shape_cast %69 : vector<2x8x8xf32> to vector<16x8xf32>
    %c8 = arith.constant 8 : index
    %c0_26 = arith.constant 0 : index
    %71 = vector.load %arg6[%c8, %c0_26] : memref<32x32xf32, #tpu.memory_space<vmem>>, vector<8x32xf32>
    %72 = arith.truncf %70 : vector<16x8xf32> to vector<16x8xbf16>
    %73 = arith.truncf %71 : vector<8x32xf32> to vector<8x32xbf16>
    %cst_27 = arith.constant dense<0.000000e+00> : vector<16x32xf32>
    %74 = tpu.matmul %72, %73, %cst_27 {dimension_numbers = #tpu.dot_dimension_numbers<[1], [0], [0], [1], [0, 0, 1, 1], [], []>} : vector<16x8xbf16>, vector<8x32xbf16>, vector<16x32xf32> -> vector<16x32xf32>
    %75 = arith.addf %48, %74 : vector<16x32xf32>
    %76 = vector.extract_strided_slice %16 {offsets = [0, 0, 16], sizes = [2, 8, 8], strides = [1, 1, 1]} : vector<2x8x32xf32> to vector<2x8x8xf32>
    %77 = vector.extract_strided_slice %18 {offsets = [0, 0, 16], sizes = [2, 8, 8], strides = [1, 1, 1]} : vector<2x8x32xf32> to vector<2x8x8xf32>
    %78 = vector.extract_strided_slice %20 {offsets = [0, 0, 16], sizes = [2, 8, 8], strides = [1, 1, 1]} : vector<2x8x32xf32> to vector<2x8x8xf32>
    %79 = arith.truncf %76 : vector<2x8x8xf32> to vector<2x8x8xbf16>
    %80 = arith.truncf %77 : vector<2x8x8xf32> to vector<2x8x8xbf16>
    "tpu.trace_start"() <{level = 10 : i32, message = "bqd,bkd->bqk"}> : () -> ()
    %cst_28 = arith.constant dense<0.000000e+00> : vector<2x8x8xf32>
    %81 = tpu.matmul %79, %80, %cst_28 {dimension_numbers = #tpu.dot_dimension_numbers<[2], [2], [1], [1], [0, 0, 0, 1, 1, 1], [0], [0]>} : vector<2x8x8xbf16>, vector<2x8x8xbf16>, vector<2x8x8xf32> -> vector<2x8x8xf32>
    "tpu.trace_stop"() : () -> ()
    %cst_29 = arith.constant 0.353553385 : f32
    %82 = vector.broadcast %cst_29 : f32 to vector<2x8x8xf32>
    %83 = arith.mulf %81, %82 : vector<2x8x8xf32>
    %cst_30 = arith.constant dense<0xFF800000> : vector<2x8xf32>
    %84 = vector.multi_reduction <maximumf>, %83, %cst_30 [2] : vector<2x8x8xf32> to vector<2x8xf32>
    %85 = vector.shape_cast %84 : vector<2x8xf32> to vector<2x8x1xf32>
    %86 = vector.broadcast %85 : vector<2x8x1xf32> to vector<2x8x8xf32>
    %87 = arith.subf %83, %86 : vector<2x8x8xf32>
    %88 = math.exp %87 : vector<2x8x8xf32>
    %cst_31 = arith.constant dense<0.000000e+00> : vector<2x8xf32>
    %89 = vector.multi_reduction <add>, %88, %cst_31 [2] : vector<2x8x8xf32> to vector<2x8xf32>
    %90 = vector.shape_cast %89 : vector<2x8xf32> to vector<2x8x1xf32>
    %91 = tpu.reciprocal %90 {approx = true} : vector<2x8x1xf32> -> vector<2x8x1xf32>
    %92 = vector.broadcast %91 : vector<2x8x1xf32> to vector<2x8x8xf32>
    %93 = arith.mulf %88, %92 : vector<2x8x8xf32>
    %94 = arith.truncf %93 : vector<2x8x8xf32> to vector<2x8x8xbf16>
    %95 = arith.truncf %78 : vector<2x8x8xf32> to vector<2x8x8xbf16>
    "tpu.trace_start"() <{level = 10 : i32, message = "bqk,bkd->bqd"}> : () -> ()
    %cst_32 = arith.constant dense<0.000000e+00> : vector<2x8x8xf32>
    %96 = tpu.matmul %94, %95, %cst_32 {dimension_numbers = #tpu.dot_dimension_numbers<[2], [1], [1], [2], [0, 0, 0, 1, 1, 2], [0], [0]>} : vector<2x8x8xbf16>, vector<2x8x8xbf16>, vector<2x8x8xf32> -> vector<2x8x8xf32>
    "tpu.trace_stop"() : () -> ()
    %97 = vector.shape_cast %96 : vector<2x8x8xf32> to vector<16x8xf32>
    %c16 = arith.constant 16 : index
    %c0_33 = arith.constant 0 : index
    %98 = vector.load %arg6[%c16, %c0_33] : memref<32x32xf32, #tpu.memory_space<vmem>>, vector<8x32xf32>
    %99 = arith.truncf %97 : vector<16x8xf32> to vector<16x8xbf16>
    %100 = arith.truncf %98 : vector<8x32xf32> to vector<8x32xbf16>
    %cst_34 = arith.constant dense<0.000000e+00> : vector<16x32xf32>
    %101 = tpu.matmul %99, %100, %cst_34 {dimension_numbers = #tpu.dot_dimension_numbers<[1], [0], [0], [1], [0, 0, 1, 1], [], []>} : vector<16x8xbf16>, vector<8x32xbf16>, vector<16x32xf32> -> vector<16x32xf32>
    %102 = arith.addf %75, %101 : vector<16x32xf32>
    %103 = vector.extract_strided_slice %16 {offsets = [0, 0, 24], sizes = [2, 8, 8], strides = [1, 1, 1]} : vector<2x8x32xf32> to vector<2x8x8xf32>
    %104 = vector.extract_strided_slice %18 {offsets = [0, 0, 24], sizes = [2, 8, 8], strides = [1, 1, 1]} : vector<2x8x32xf32> to vector<2x8x8xf32>
    %105 = vector.extract_strided_slice %20 {offsets = [0, 0, 24], sizes = [2, 8, 8], strides = [1, 1, 1]} : vector<2x8x32xf32> to vector<2x8x8xf32>
    %106 = arith.truncf %103 : vector<2x8x8xf32> to vector<2x8x8xbf16>
    %107 = arith.truncf %104 : vector<2x8x8xf32> to vector<2x8x8xbf16>
    "tpu.trace_start"() <{level = 10 : i32, message = "bqd,bkd->bqk"}> : () -> ()
    %cst_35 = arith.constant dense<0.000000e+00> : vector<2x8x8xf32>
    %108 = tpu.matmul %106, %107, %cst_35 {dimension_numbers = #tpu.dot_dimension_numbers<[2], [2], [1], [1], [0, 0, 0, 1, 1, 1], [0], [0]>} : vector<2x8x8xbf16>, vector<2x8x8xbf16>, vector<2x8x8xf32> -> vector<2x8x8xf32>
    "tpu.trace_stop"() : () -> ()
    %cst_36 = arith.constant 0.353553385 : f32
    %109 = vector.broadcast %cst_36 : f32 to vector<2x8x8xf32>
    %110 = arith.mulf %108, %109 : vector<2x8x8xf32>
    %cst_37 = arith.constant dense<0xFF800000> : vector<2x8xf32>
    %111 = vector.multi_reduction <maximumf>, %110, %cst_37 [2] : vector<2x8x8xf32> to vector<2x8xf32>
    %112 = vector.shape_cast %111 : vector<2x8xf32> to vector<2x8x1xf32>
    %113 = vector.broadcast %112 : vector<2x8x1xf32> to vector<2x8x8xf32>
    %114 = arith.subf %110, %113 : vector<2x8x8xf32>
    %115 = math.exp %114 : vector<2x8x8xf32>
    %cst_38 = arith.constant dense<0.000000e+00> : vector<2x8xf32>
    %116 = vector.multi_reduction <add>, %115, %cst_38 [2] : vector<2x8x8xf32> to vector<2x8xf32>
    %117 = vector.shape_cast %116 : vector<2x8xf32> to vector<2x8x1xf32>
    %118 = tpu.reciprocal %117 {approx = true} : vector<2x8x1xf32> -> vector<2x8x1xf32>
    %119 = vector.broadcast %118 : vector<2x8x1xf32> to vector<2x8x8xf32>
    %120 = arith.mulf %115, %119 : vector<2x8x8xf32>
    %121 = arith.truncf %120 : vector<2x8x8xf32> to vector<2x8x8xbf16>
    %122 = arith.truncf %105 : vector<2x8x8xf32> to vector<2x8x8xbf16>
    "tpu.trace_start"() <{level = 10 : i32, message = "bqk,bkd->bqd"}> : () -> ()
    %cst_39 = arith.constant dense<0.000000e+00> : vector<2x8x8xf32>
    %123 = tpu.matmul %121, %122, %cst_39 {dimension_numbers = #tpu.dot_dimension_numbers<[2], [1], [1], [2], [0, 0, 0, 1, 1, 2], [0], [0]>} : vector<2x8x8xbf16>, vector<2x8x8xbf16>, vector<2x8x8xf32> -> vector<2x8x8xf32>
    "tpu.trace_stop"() : () -> ()
    %124 = vector.shape_cast %123 : vector<2x8x8xf32> to vector<16x8xf32>
    %c24 = arith.constant 24 : index
    %c0_40 = arith.constant 0 : index
    %125 = vector.load %arg6[%c24, %c0_40] : memref<32x32xf32, #tpu.memory_space<vmem>>, vector<8x32xf32>
    %126 = arith.truncf %124 : vector<16x8xf32> to vector<16x8xbf16>
    %127 = arith.truncf %125 : vector<8x32xf32> to vector<8x32xbf16>
    %cst_41 = arith.constant dense<0.000000e+00> : vector<16x32xf32>
    %128 = tpu.matmul %126, %127, %cst_41 {dimension_numbers = #tpu.dot_dimension_numbers<[1], [0], [0], [1], [0, 0, 1, 1], [], []>} : vector<16x8xbf16>, vector<8x32xbf16>, vector<16x32xf32> -> vector<16x32xf32>
    %129 = arith.addf %102, %128 : vector<16x32xf32>
    %c0_42 = arith.constant 0 : index
    %c0_43 = arith.constant 0 : index
    %130 = vector.load %arg7[%c0_42, %c0_43] : memref<1x32xf32, #tpu.memory_space<vmem>>, vector<1x32xf32>
    %131 = vector.broadcast %130 : vector<1x32xf32> to vector<16x32xf32>
    %132 = arith.addf %129, %131 : vector<16x32xf32>
    %133 = arith.addf %0, %132 : vector<16x32xf32>
    %cst_44 = arith.constant dense<0.000000e+00> : vector<16xf32>
    %134 = vector.multi_reduction <add>, %133, %cst_44 [1] : vector<16x32xf32> to vector<16xf32>
    %135 = vector.shape_cast %134 : vector<16xf32> to vector<16x1xf32>
    %cst_45 = arith.constant 3.200000e+01 : f32
    %136 = vector.broadcast %cst_45 : f32 to vector<16x1xf32>
    %137 = arith.divf %135, %136 : vector<16x1xf32>
    %138 = vector.broadcast %137 : vector<16x1xf32> to vector<16x32xf32>
    %139 = arith.subf %133, %138 : vector<16x32xf32>
    %140 = arith.mulf %139, %139 : vector<16x32xf32>
    %cst_46 = arith.constant dense<0.000000e+00> : vector<16xf32>
    %141 = vector.multi_reduction <add>, %140, %cst_46 [1] : vector<16x32xf32> to vector<16xf32>
    %142 = vector.shape_cast %141 : vector<16xf32> to vector<16x1xf32>
    %cst_47 = arith.constant 3.200000e+01 : f32
    %143 = vector.broadcast %cst_47 : f32 to vector<16x1xf32>
    %144 = arith.divf %142, %143 : vector<16x1xf32>
    %145 = vector.broadcast %137 : vector<16x1xf32> to vector<16x32xf32>
    %146 = arith.subf %133, %145 : vector<16x32xf32>
    %cst_48 = arith.constant 9.99999974E-6 : f32
    %147 = vector.broadcast %cst_48 : f32 to vector<16x1xf32>
    %148 = arith.addf %144, %147 : vector<16x1xf32>
    %149 = math.rsqrt %148 : vector<16x1xf32>
    %150 = vector.broadcast %149 : vector<16x1xf32> to vector<16x32xf32>
    %151 = arith.mulf %146, %150 : vector<16x32xf32>
    %c0_49 = arith.constant 0 : index
    %c0_50 = arith.constant 0 : index
    %152 = vector.load %arg8[%c0_49, %c0_50] : memref<1x32xf32, #tpu.memory_space<vmem>>, vector<1x32xf32>
    %153 = vector.broadcast %152 : vector<1x32xf32> to vector<16x32xf32>
    %154 = arith.mulf %151, %153 : vector<16x32xf32>
    %c0_51 = arith.constant 0 : index
    %c0_52 = arith.constant 0 : index
    %155 = vector.load %arg9[%c0_51, %c0_52] : memref<1x32xf32, #tpu.memory_space<vmem>>, vector<1x32xf32>
    %156 = vector.broadcast %155 : vector<1x32xf32> to vector<16x32xf32>
    %157 = arith.addf %154, %156 : vector<16x32xf32>
    %c0_53 = arith.constant 0 : index
    %c0_54 = arith.constant 0 : index
    %158 = vector.load %arg10[%c0_53, %c0_54] : memref<16x32xf32, #tpu.memory_space<vmem>>, vector<16x32xf32>
    tpu.vector_store %arg10[%c0_53, %c0_54], %157 {strides = array<i32>} : memref<16x32xf32, #tpu.memory_space<vmem>>, vector<16x32xf32>,
    return
  }
}

module attributes {stable_mosaic.version = 11 : i64} {
  func.func @_ffn_ln_kernel(%arg0: memref<16x32xf32, #tpu.memory_space<vmem>>, %arg1: memref<32x64xf32, #tpu.memory_space<vmem>>, %arg2: memref<1x64xf32, #tpu.memory_space<vmem>>, %arg3: memref<64x32xf32, #tpu.memory_space<vmem>>, %arg4: memref<1x32xf32, #tpu.memory_space<vmem>>, %arg5: memref<1x32xf32, #tpu.memory_space<vmem>>, %arg6: memref<1x32xf32, #tpu.memory_space<vmem>>, %arg7: memref<16x32xf32, #tpu.memory_space<vmem>>) attributes {dimension_semantics = [], scalar_prefetch = 0 : i64, scratch_operands = 0 : i64, tpu.core_type = #tpu.core_type<tc>} {
    %c0 = arith.constant 0 : index
    %c0_0 = arith.constant 0 : index
    %0 = vector.load %arg0[%c0, %c0_0] : memref<16x32xf32, #tpu.memory_space<vmem>>, vector<16x32xf32>
    %c0_1 = arith.constant 0 : index
    %c0_2 = arith.constant 0 : index
    %1 = vector.load %arg1[%c0_1, %c0_2] : memref<32x64xf32, #tpu.memory_space<vmem>>, vector<32x64xf32>
    %2 = arith.truncf %0 : vector<16x32xf32> to vector<16x32xbf16>
    %3 = arith.truncf %1 : vector<32x64xf32> to vector<32x64xbf16>
    %cst = arith.constant dense<0.000000e+00> : vector<16x64xf32>
    %4 = tpu.matmul %2, %3, %cst {dimension_numbers = #tpu.dot_dimension_numbers<[1], [0], [0], [1], [0, 0, 1, 1], [], []>} : vector<16x32xbf16>, vector<32x64xbf16>, vector<16x64xf32> -> vector<16x64xf32>
    %c0_3 = arith.constant 0 : index
    %c0_4 = arith.constant 0 : index
    %5 = vector.load %arg2[%c0_3, %c0_4] : memref<1x64xf32, #tpu.memory_space<vmem>>, vector<1x64xf32>
    %6 = vector.broadcast %5 : vector<1x64xf32> to vector<16x64xf32>
    %7 = arith.addf %4, %6 : vector<16x64xf32>
    %cst_5 = arith.constant 0.000000e+00 : f32
    %8 = vector.broadcast %cst_5 : f32 to vector<16x64xf32>
    %9 = arith.maximumf %7, %8 : vector<16x64xf32>
    %c0_6 = arith.constant 0 : index
    %c0_7 = arith.constant 0 : index
    %10 = vector.load %arg3[%c0_6, %c0_7] : memref<64x32xf32, #tpu.memory_space<vmem>>, vector<64x32xf32>
    %11 = arith.truncf %9 : vector<16x64xf32> to vector<16x64xbf16>
    %12 = arith.truncf %10 : vector<64x32xf32> to vector<64x32xbf16>
    %cst_8 = arith.constant dense<0.000000e+00> : vector<16x32xf32>
    %13 = tpu.matmul %11, %12, %cst_8 {dimension_numbers = #tpu.dot_dimension_numbers<[1], [0], [0], [1], [0, 0, 1, 1], [], []>} : vector<16x64xbf16>, vector<64x32xbf16>, vector<16x32xf32> -> vector<16x32xf32>
    %c0_9 = arith.constant 0 : index
    %c0_10 = arith.constant 0 : index
    %14 = vector.load %arg4[%c0_9, %c0_10] : memref<1x32xf32, #tpu.memory_space<vmem>>, vector<1x32xf32>
    %15 = vector.broadcast %14 : vector<1x32xf32> to vector<16x32xf32>
    %16 = arith.addf %13, %15 : vector<16x32xf32>
    %17 = arith.addf %0, %16 : vector<16x32xf32>
    %cst_11 = arith.constant dense<0.000000e+00> : vector<16xf32>
    %18 = vector.multi_reduction <add>, %17, %cst_11 [1] : vector<16x32xf32> to vector<16xf32>
    %19 = vector.shape_cast %18 : vector<16xf32> to vector<16x1xf32>
    %cst_12 = arith.constant 3.200000e+01 : f32
    %20 = vector.broadcast %cst_12 : f32 to vector<16x1xf32>
    %21 = arith.divf %19, %20 : vector<16x1xf32>
    %22 = vector.broadcast %21 : vector<16x1xf32> to vector<16x32xf32>
    %23 = arith.subf %17, %22 : vector<16x32xf32>
    %24 = arith.mulf %23, %23 : vector<16x32xf32>
    %cst_13 = arith.constant dense<0.000000e+00> : vector<16xf32>
    %25 = vector.multi_reduction <add>, %24, %cst_13 [1] : vector<16x32xf32> to vector<16xf32>
    %26 = vector.shape_cast %25 : vector<16xf32> to vector<16x1xf32>
    %cst_14 = arith.constant 3.200000e+01 : f32
    %27 = vector.broadcast %cst_14 : f32 to vector<16x1xf32>
    %28 = arith.divf %26, %27 : vector<16x1xf32>
    %29 = vector.broadcast %21 : vector<16x1xf32> to vector<16x32xf32>
    %30 = arith.subf %17, %29 : vector<16x32xf32>
    %cst_15 = arith.constant 9.99999974E-6 : f32
    %31 = vector.broadcast %cst_15 : f32 to vector<16x1xf32>
    %32 = arith.addf %28, %31 : vector<16x1xf32>
    %33 = math.rsqrt %32 : vector<16x1xf32>
    %34 = vector.broadcast %33 : vector<16x1xf32> to vector<16x32xf32>
    %35 = arith.mulf %30, %34 : vector<16x32xf32>
    %c0_16 = arith.constant 0 : index
    %c0_17 = arith.constant 0 : index
    %36 = vector.load %arg5[%c0_16, %c0_17] : memref<1x32xf32, #tpu.memory_space<vmem>>, vector<1x32xf32>
    %37 = vector.broadcast %36 : vector<1x32xf32> to vector<16x32xf32>
    %38 = arith.mulf %35, %37 : vector<16x32xf32>
    %c0_18 = arith.constant 0 : index
    %c0_19 = arith.constant 0 : index
    %39 = vector.load %arg6[%c0_18, %c0_19] : memref<1x32xf32, #tpu.memory_space<vmem>>, vector<1x32xf32>
    %40 = vector.broadcast %39 : vector<1x32xf32> to vector<16x32xf32>
    %41 = arith.addf %38, %40 : vector<16x32xf32>
    %c0_20 = arith.constant 0 : index
    %c0_21 = arith.constant 0 : index
    %42 = vector.load %arg7[%c0_20, %c0_21] : memref<16x32xf32, #tpu.memory_space<vmem>>, vector<16x32xf32>
    tpu.vector_store %arg7[%c0_20, %c0_21], %41 {strides = array<i32>} : memref<16x32xf32, #tpu.memory_space<vmem>>, vector<16x32xf32>,
    return
  }
}

module attributes {stable_mosaic.version = 11 : i64} {
  func.func @_mha_ln_kernel(%arg0: memref<16x32xf32, #tpu.memory_space<vmem>>, %arg1: memref<16x32xf32, #tpu.memory_space<vmem>>, %arg2: memref<32x32xf32, #tpu.memory_space<vmem>>, %arg3: memref<1x32xf32, #tpu.memory_space<vmem>>, %arg4: memref<32x64xf32, #tpu.memory_space<vmem>>, %arg5: memref<1x64xf32, #tpu.memory_space<vmem>>, %arg6: memref<32x32xf32, #tpu.memory_space<vmem>>, %arg7: memref<1x32xf32, #tpu.memory_space<vmem>>, %arg8: memref<8x8xf32, #tpu.memory_space<vmem>>, %arg9: memref<1x32xf32, #tpu.memory_space<vmem>>, %arg10: memref<1x32xf32, #tpu.memory_space<vmem>>, %arg11: memref<16x32xf32, #tpu.memory_space<vmem>>) attributes {dimension_semantics = [], scalar_prefetch = 0 : i64, scratch_operands = 0 : i64, tpu.core_type = #tpu.core_type<tc>} {
    %c0 = arith.constant 0 : index
    %c0_0 = arith.constant 0 : index
    %0 = vector.load %arg0[%c0, %c0_0] : memref<16x32xf32, #tpu.memory_space<vmem>>, vector<16x32xf32>
    %c0_1 = arith.constant 0 : index
    %c0_2 = arith.constant 0 : index
    %1 = vector.load %arg1[%c0_1, %c0_2] : memref<16x32xf32, #tpu.memory_space<vmem>>, vector<16x32xf32>
    %c0_3 = arith.constant 0 : index
    %c0_4 = arith.constant 0 : index
    %2 = vector.load %arg2[%c0_3, %c0_4] : memref<32x32xf32, #tpu.memory_space<vmem>>, vector<32x32xf32>
    %3 = arith.truncf %0 : vector<16x32xf32> to vector<16x32xbf16>
    %4 = arith.truncf %2 : vector<32x32xf32> to vector<32x32xbf16>
    %cst = arith.constant dense<0.000000e+00> : vector<16x32xf32>
    %5 = tpu.matmul %3, %4, %cst {dimension_numbers = #tpu.dot_dimension_numbers<[1], [0], [0], [1], [0, 0, 1, 1], [], []>} : vector<16x32xbf16>, vector<32x32xbf16>, vector<16x32xf32> -> vector<16x32xf32>
    %c0_5 = arith.constant 0 : index
    %c0_6 = arith.constant 0 : index
    %6 = vector.load %arg3[%c0_5, %c0_6] : memref<1x32xf32, #tpu.memory_space<vmem>>, vector<1x32xf32>
    %7 = vector.broadcast %6 : vector<1x32xf32> to vector<16x32xf32>
    %8 = arith.addf %5, %7 : vector<16x32xf32>
    %c0_7 = arith.constant 0 : index
    %c0_8 = arith.constant 0 : index
    %9 = vector.load %arg4[%c0_7, %c0_8] : memref<32x64xf32, #tpu.memory_space<vmem>>, vector<32x64xf32>
    %10 = arith.truncf %1 : vector<16x32xf32> to vector<16x32xbf16>
    %11 = arith.truncf %9 : vector<32x64xf32> to vector<32x64xbf16>
    %cst_9 = arith.constant dense<0.000000e+00> : vector<16x64xf32>
    %12 = tpu.matmul %10, %11, %cst_9 {dimension_numbers = #tpu.dot_dimension_numbers<[1], [0], [0], [1], [0, 0, 1, 1], [], []>} : vector<16x32xbf16>, vector<32x64xbf16>, vector<16x64xf32> -> vector<16x64xf32>
    %c0_10 = arith.constant 0 : index
    %c0_11 = arith.constant 0 : index
    %13 = vector.load %arg5[%c0_10, %c0_11] : memref<1x64xf32, #tpu.memory_space<vmem>>, vector<1x64xf32>
    %14 = vector.broadcast %13 : vector<1x64xf32> to vector<16x64xf32>
    %15 = arith.addf %12, %14 : vector<16x64xf32>
    %16 = vector.shape_cast %8 : vector<16x32xf32> to vector<2x8x32xf32>
    %17 = vector.extract_strided_slice %15 {offsets = [0, 0], sizes = [16, 32], strides = [1, 1]} : vector<16x64xf32> to vector<16x32xf32>
    %18 = vector.shape_cast %17 : vector<16x32xf32> to vector<2x8x32xf32>
    %19 = vector.extract_strided_slice %15 {offsets = [0, 32], sizes = [16, 32], strides = [1, 1]} : vector<16x64xf32> to vector<16x32xf32>
    %20 = vector.shape_cast %19 : vector<16x32xf32> to vector<2x8x32xf32>
    %c0_12 = arith.constant 0 : index
    %c0_13 = arith.constant 0 : index
    %21 = vector.load %arg8[%c0_12, %c0_13] : memref<8x8xf32, #tpu.memory_space<vmem>>, vector<8x8xf32>
    %22 = vector.shape_cast %21 : vector<8x8xf32> to vector<1x8x8xf32>
    %cst_14 = arith.constant 0.000000e+00 : f32
    %23 = vector.broadcast %cst_14 : f32 to vector<1x8x8xf32>
    %24 = arith.cmpf ogt, %22, %23 : vector<1x8x8xf32>
    %cst_15 = arith.constant 0.000000e+00 : f32
    %25 = vector.broadcast %cst_15 : f32 to vector<16x32xf32>
    %26 = vector.extract_strided_slice %16 {offsets = [0, 0, 0], sizes = [2, 8, 8], strides = [1, 1, 1]} : vector<2x8x32xf32> to vector<2x8x8xf32>
    %27 = vector.extract_strided_slice %18 {offsets = [0, 0, 0], sizes = [2, 8, 8], strides = [1, 1, 1]} : vector<2x8x32xf32> to vector<2x8x8xf32>
    %28 = vector.extract_strided_slice %20 {offsets = [0, 0, 0], sizes = [2, 8, 8], strides = [1, 1, 1]} : vector<2x8x32xf32> to vector<2x8x8xf32>
    %29 = arith.truncf %26 : vector<2x8x8xf32> to vector<2x8x8xbf16>
    %30 = arith.truncf %27 : vector<2x8x8xf32> to vector<2x8x8xbf16>
    "tpu.trace_start"() <{level = 10 : i32, message = "bqd,bkd->bqk"}> : () -> ()
    %cst_16 = arith.constant dense<0.000000e+00> : vector<2x8x8xf32>
    %31 = tpu.matmul %29, %30, %cst_16 {dimension_numbers = #tpu.dot_dimension_numbers<[2], [2], [1], [1], [0, 0, 0, 1, 1, 1], [0], [0]>} : vector<2x8x8xbf16>, vector<2x8x8xbf16>, vector<2x8x8xf32> -> vector<2x8x8xf32>
    "tpu.trace_stop"() : () -> ()
    %cst_17 = arith.constant 0.353553385 : f32
    %32 = vector.broadcast %cst_17 : f32 to vector<2x8x8xf32>
    %33 = arith.mulf %31, %32 : vector<2x8x8xf32>
    %cst_18 = arith.constant -1.000000e+09 : f32
    %34 = vector.shape_cast %24 : vector<1x8x8xi1> to vector<1x8x8xi1>
    %35 = vector.broadcast %34 : vector<1x8x8xi1> to vector<2x8x8xi1>
    %36 = vector.broadcast %cst_18 : f32 to vector<2x8x8xf32>
    %37 = arith.select %35, %33, %36 : vector<2x8x8xi1>, vector<2x8x8xf32>
    %cst_19 = arith.constant dense<0xFF800000> : vector<2x8xf32>
    %38 = vector.multi_reduction <maximumf>, %37, %cst_19 [2] : vector<2x8x8xf32> to vector<2x8xf32>
    %39 = vector.shape_cast %38 : vector<2x8xf32> to vector<2x8x1xf32>
    %40 = vector.broadcast %39 : vector<2x8x1xf32> to vector<2x8x8xf32>
    %41 = arith.subf %37, %40 : vector<2x8x8xf32>
    %42 = math.exp %41 : vector<2x8x8xf32>
    %cst_20 = arith.constant dense<0.000000e+00> : vector<2x8xf32>
    %43 = vector.multi_reduction <add>, %42, %cst_20 [2] : vector<2x8x8xf32> to vector<2x8xf32>
    %44 = vector.shape_cast %43 : vector<2x8xf32> to vector<2x8x1xf32>
    %45 = tpu.reciprocal %44 {approx = true} : vector<2x8x1xf32> -> vector<2x8x1xf32>
    %46 = vector.broadcast %45 : vector<2x8x1xf32> to vector<2x8x8xf32>
    %47 = arith.mulf %42, %46 : vector<2x8x8xf32>
    %48 = arith.truncf %47 : vector<2x8x8xf32> to vector<2x8x8xbf16>
    %49 = arith.truncf %28 : vector<2x8x8xf32> to vector<2x8x8xbf16>
    "tpu.trace_start"() <{level = 10 : i32, message = "bqk,bkd->bqd"}> : () -> ()
    %cst_21 = arith.constant dense<0.000000e+00> : vector<2x8x8xf32>
    %50 = tpu.matmul %48, %49, %cst_21 {dimension_numbers = #tpu.dot_dimension_numbers<[2], [1], [1], [2], [0, 0, 0, 1, 1, 2], [0], [0]>} : vector<2x8x8xbf16>, vector<2x8x8xbf16>, vector<2x8x8xf32> -> vector<2x8x8xf32>
    "tpu.trace_stop"() : () -> ()
    %51 = vector.shape_cast %50 : vector<2x8x8xf32> to vector<16x8xf32>
    %c0_22 = arith.constant 0 : index
    %c0_23 = arith.constant 0 : index
    %52 = vector.load %arg6[%c0_22, %c0_23] : memref<32x32xf32, #tpu.memory_space<vmem>>, vector<8x32xf32>
    %53 = arith.truncf %51 : vector<16x8xf32> to vector<16x8xbf16>
    %54 = arith.truncf %52 : vector<8x32xf32> to vector<8x32xbf16>
    %cst_24 = arith.constant dense<0.000000e+00> : vector<16x32xf32>
    %55 = tpu.matmul %53, %54, %cst_24 {dimension_numbers = #tpu.dot_dimension_numbers<[1], [0], [0], [1], [0, 0, 1, 1], [], []>} : vector<16x8xbf16>, vector<8x32xbf16>, vector<16x32xf32> -> vector<16x32xf32>
    %56 = arith.addf %25, %55 : vector<16x32xf32>
    %57 = vector.extract_strided_slice %16 {offsets = [0, 0, 8], sizes = [2, 8, 8], strides = [1, 1, 1]} : vector<2x8x32xf32> to vector<2x8x8xf32>
    %58 = vector.extract_strided_slice %18 {offsets = [0, 0, 8], sizes = [2, 8, 8], strides = [1, 1, 1]} : vector<2x8x32xf32> to vector<2x8x8xf32>
    %59 = vector.extract_strided_slice %20 {offsets = [0, 0, 8], sizes = [2, 8, 8], strides = [1, 1, 1]} : vector<2x8x32xf32> to vector<2x8x8xf32>
    %60 = arith.truncf %57 : vector<2x8x8xf32> to vector<2x8x8xbf16>
    %61 = arith.truncf %58 : vector<2x8x8xf32> to vector<2x8x8xbf16>
    "tpu.trace_start"() <{level = 10 : i32, message = "bqd,bkd->bqk"}> : () -> ()
    %cst_25 = arith.constant dense<0.000000e+00> : vector<2x8x8xf32>
    %62 = tpu.matmul %60, %61, %cst_25 {dimension_numbers = #tpu.dot_dimension_numbers<[2], [2], [1], [1], [0, 0, 0, 1, 1, 1], [0], [0]>} : vector<2x8x8xbf16>, vector<2x8x8xbf16>, vector<2x8x8xf32> -> vector<2x8x8xf32>
    "tpu.trace_stop"() : () -> ()
    %cst_26 = arith.constant 0.353553385 : f32
    %63 = vector.broadcast %cst_26 : f32 to vector<2x8x8xf32>
    %64 = arith.mulf %62, %63 : vector<2x8x8xf32>
    %cst_27 = arith.constant -1.000000e+09 : f32
    %65 = vector.shape_cast %24 : vector<1x8x8xi1> to vector<1x8x8xi1>
    %66 = vector.broadcast %65 : vector<1x8x8xi1> to vector<2x8x8xi1>
    %67 = vector.broadcast %cst_27 : f32 to vector<2x8x8xf32>
    %68 = arith.select %66, %64, %67 : vector<2x8x8xi1>, vector<2x8x8xf32>
    %cst_28 = arith.constant dense<0xFF800000> : vector<2x8xf32>
    %69 = vector.multi_reduction <maximumf>, %68, %cst_28 [2] : vector<2x8x8xf32> to vector<2x8xf32>
    %70 = vector.shape_cast %69 : vector<2x8xf32> to vector<2x8x1xf32>
    %71 = vector.broadcast %70 : vector<2x8x1xf32> to vector<2x8x8xf32>
    %72 = arith.subf %68, %71 : vector<2x8x8xf32>
    %73 = math.exp %72 : vector<2x8x8xf32>
    %cst_29 = arith.constant dense<0.000000e+00> : vector<2x8xf32>
    %74 = vector.multi_reduction <add>, %73, %cst_29 [2] : vector<2x8x8xf32> to vector<2x8xf32>
    %75 = vector.shape_cast %74 : vector<2x8xf32> to vector<2x8x1xf32>
    %76 = tpu.reciprocal %75 {approx = true} : vector<2x8x1xf32> -> vector<2x8x1xf32>
    %77 = vector.broadcast %76 : vector<2x8x1xf32> to vector<2x8x8xf32>
    %78 = arith.mulf %73, %77 : vector<2x8x8xf32>
    %79 = arith.truncf %78 : vector<2x8x8xf32> to vector<2x8x8xbf16>
    %80 = arith.truncf %59 : vector<2x8x8xf32> to vector<2x8x8xbf16>
    "tpu.trace_start"() <{level = 10 : i32, message = "bqk,bkd->bqd"}> : () -> ()
    %cst_30 = arith.constant dense<0.000000e+00> : vector<2x8x8xf32>
    %81 = tpu.matmul %79, %80, %cst_30 {dimension_numbers = #tpu.dot_dimension_numbers<[2], [1], [1], [2], [0, 0, 0, 1, 1, 2], [0], [0]>} : vector<2x8x8xbf16>, vector<2x8x8xbf16>, vector<2x8x8xf32> -> vector<2x8x8xf32>
    "tpu.trace_stop"() : () -> ()
    %82 = vector.shape_cast %81 : vector<2x8x8xf32> to vector<16x8xf32>
    %c8 = arith.constant 8 : index
    %c0_31 = arith.constant 0 : index
    %83 = vector.load %arg6[%c8, %c0_31] : memref<32x32xf32, #tpu.memory_space<vmem>>, vector<8x32xf32>
    %84 = arith.truncf %82 : vector<16x8xf32> to vector<16x8xbf16>
    %85 = arith.truncf %83 : vector<8x32xf32> to vector<8x32xbf16>
    %cst_32 = arith.constant dense<0.000000e+00> : vector<16x32xf32>
    %86 = tpu.matmul %84, %85, %cst_32 {dimension_numbers = #tpu.dot_dimension_numbers<[1], [0], [0], [1], [0, 0, 1, 1], [], []>} : vector<16x8xbf16>, vector<8x32xbf16>, vector<16x32xf32> -> vector<16x32xf32>
    %87 = arith.addf %56, %86 : vector<16x32xf32>
    %88 = vector.extract_strided_slice %16 {offsets = [0, 0, 16], sizes = [2, 8, 8], strides = [1, 1, 1]} : vector<2x8x32xf32> to vector<2x8x8xf32>
    %89 = vector.extract_strided_slice %18 {offsets = [0, 0, 16], sizes = [2, 8, 8], strides = [1, 1, 1]} : vector<2x8x32xf32> to vector<2x8x8xf32>
    %90 = vector.extract_strided_slice %20 {offsets = [0, 0, 16], sizes = [2, 8, 8], strides = [1, 1, 1]} : vector<2x8x32xf32> to vector<2x8x8xf32>
    %91 = arith.truncf %88 : vector<2x8x8xf32> to vector<2x8x8xbf16>
    %92 = arith.truncf %89 : vector<2x8x8xf32> to vector<2x8x8xbf16>
    "tpu.trace_start"() <{level = 10 : i32, message = "bqd,bkd->bqk"}> : () -> ()
    %cst_33 = arith.constant dense<0.000000e+00> : vector<2x8x8xf32>
    %93 = tpu.matmul %91, %92, %cst_33 {dimension_numbers = #tpu.dot_dimension_numbers<[2], [2], [1], [1], [0, 0, 0, 1, 1, 1], [0], [0]>} : vector<2x8x8xbf16>, vector<2x8x8xbf16>, vector<2x8x8xf32> -> vector<2x8x8xf32>
    "tpu.trace_stop"() : () -> ()
    %cst_34 = arith.constant 0.353553385 : f32
    %94 = vector.broadcast %cst_34 : f32 to vector<2x8x8xf32>
    %95 = arith.mulf %93, %94 : vector<2x8x8xf32>
    %cst_35 = arith.constant -1.000000e+09 : f32
    %96 = vector.shape_cast %24 : vector<1x8x8xi1> to vector<1x8x8xi1>
    %97 = vector.broadcast %96 : vector<1x8x8xi1> to vector<2x8x8xi1>
    %98 = vector.broadcast %cst_35 : f32 to vector<2x8x8xf32>
    %99 = arith.select %97, %95, %98 : vector<2x8x8xi1>, vector<2x8x8xf32>
    %cst_36 = arith.constant dense<0xFF800000> : vector<2x8xf32>
    %100 = vector.multi_reduction <maximumf>, %99, %cst_36 [2] : vector<2x8x8xf32> to vector<2x8xf32>
    %101 = vector.shape_cast %100 : vector<2x8xf32> to vector<2x8x1xf32>
    %102 = vector.broadcast %101 : vector<2x8x1xf32> to vector<2x8x8xf32>
    %103 = arith.subf %99, %102 : vector<2x8x8xf32>
    %104 = math.exp %103 : vector<2x8x8xf32>
    %cst_37 = arith.constant dense<0.000000e+00> : vector<2x8xf32>
    %105 = vector.multi_reduction <add>, %104, %cst_37 [2] : vector<2x8x8xf32> to vector<2x8xf32>
    %106 = vector.shape_cast %105 : vector<2x8xf32> to vector<2x8x1xf32>
    %107 = tpu.reciprocal %106 {approx = true} : vector<2x8x1xf32> -> vector<2x8x1xf32>
    %108 = vector.broadcast %107 : vector<2x8x1xf32> to vector<2x8x8xf32>
    %109 = arith.mulf %104, %108 : vector<2x8x8xf32>
    %110 = arith.truncf %109 : vector<2x8x8xf32> to vector<2x8x8xbf16>
    %111 = arith.truncf %90 : vector<2x8x8xf32> to vector<2x8x8xbf16>
    "tpu.trace_start"() <{level = 10 : i32, message = "bqk,bkd->bqd"}> : () -> ()
    %cst_38 = arith.constant dense<0.000000e+00> : vector<2x8x8xf32>
    %112 = tpu.matmul %110, %111, %cst_38 {dimension_numbers = #tpu.dot_dimension_numbers<[2], [1], [1], [2], [0, 0, 0, 1, 1, 2], [0], [0]>} : vector<2x8x8xbf16>, vector<2x8x8xbf16>, vector<2x8x8xf32> -> vector<2x8x8xf32>
    "tpu.trace_stop"() : () -> ()
    %113 = vector.shape_cast %112 : vector<2x8x8xf32> to vector<16x8xf32>
    %c16 = arith.constant 16 : index
    %c0_39 = arith.constant 0 : index
    %114 = vector.load %arg6[%c16, %c0_39] : memref<32x32xf32, #tpu.memory_space<vmem>>, vector<8x32xf32>
    %115 = arith.truncf %113 : vector<16x8xf32> to vector<16x8xbf16>
    %116 = arith.truncf %114 : vector<8x32xf32> to vector<8x32xbf16>
    %cst_40 = arith.constant dense<0.000000e+00> : vector<16x32xf32>
    %117 = tpu.matmul %115, %116, %cst_40 {dimension_numbers = #tpu.dot_dimension_numbers<[1], [0], [0], [1], [0, 0, 1, 1], [], []>} : vector<16x8xbf16>, vector<8x32xbf16>, vector<16x32xf32> -> vector<16x32xf32>
    %118 = arith.addf %87, %117 : vector<16x32xf32>
    %119 = vector.extract_strided_slice %16 {offsets = [0, 0, 24], sizes = [2, 8, 8], strides = [1, 1, 1]} : vector<2x8x32xf32> to vector<2x8x8xf32>
    %120 = vector.extract_strided_slice %18 {offsets = [0, 0, 24], sizes = [2, 8, 8], strides = [1, 1, 1]} : vector<2x8x32xf32> to vector<2x8x8xf32>
    %121 = vector.extract_strided_slice %20 {offsets = [0, 0, 24], sizes = [2, 8, 8], strides = [1, 1, 1]} : vector<2x8x32xf32> to vector<2x8x8xf32>
    %122 = arith.truncf %119 : vector<2x8x8xf32> to vector<2x8x8xbf16>
    %123 = arith.truncf %120 : vector<2x8x8xf32> to vector<2x8x8xbf16>
    "tpu.trace_start"() <{level = 10 : i32, message = "bqd,bkd->bqk"}> : () -> ()
    %cst_41 = arith.constant dense<0.000000e+00> : vector<2x8x8xf32>
    %124 = tpu.matmul %122, %123, %cst_41 {dimension_numbers = #tpu.dot_dimension_numbers<[2], [2], [1], [1], [0, 0, 0, 1, 1, 1], [0], [0]>} : vector<2x8x8xbf16>, vector<2x8x8xbf16>, vector<2x8x8xf32> -> vector<2x8x8xf32>
    "tpu.trace_stop"() : () -> ()
    %cst_42 = arith.constant 0.353553385 : f32
    %125 = vector.broadcast %cst_42 : f32 to vector<2x8x8xf32>
    %126 = arith.mulf %124, %125 : vector<2x8x8xf32>
    %cst_43 = arith.constant -1.000000e+09 : f32
    %127 = vector.shape_cast %24 : vector<1x8x8xi1> to vector<1x8x8xi1>
    %128 = vector.broadcast %127 : vector<1x8x8xi1> to vector<2x8x8xi1>
    %129 = vector.broadcast %cst_43 : f32 to vector<2x8x8xf32>
    %130 = arith.select %128, %126, %129 : vector<2x8x8xi1>, vector<2x8x8xf32>
    %cst_44 = arith.constant dense<0xFF800000> : vector<2x8xf32>
    %131 = vector.multi_reduction <maximumf>, %130, %cst_44 [2] : vector<2x8x8xf32> to vector<2x8xf32>
    %132 = vector.shape_cast %131 : vector<2x8xf32> to vector<2x8x1xf32>
    %133 = vector.broadcast %132 : vector<2x8x1xf32> to vector<2x8x8xf32>
    %134 = arith.subf %130, %133 : vector<2x8x8xf32>
    %135 = math.exp %134 : vector<2x8x8xf32>
    %cst_45 = arith.constant dense<0.000000e+00> : vector<2x8xf32>
    %136 = vector.multi_reduction <add>, %135, %cst_45 [2] : vector<2x8x8xf32> to vector<2x8xf32>
    %137 = vector.shape_cast %136 : vector<2x8xf32> to vector<2x8x1xf32>
    %138 = tpu.reciprocal %137 {approx = true} : vector<2x8x1xf32> -> vector<2x8x1xf32>
    %139 = vector.broadcast %138 : vector<2x8x1xf32> to vector<2x8x8xf32>
    %140 = arith.mulf %135, %139 : vector<2x8x8xf32>
    %141 = arith.truncf %140 : vector<2x8x8xf32> to vector<2x8x8xbf16>
    %142 = arith.truncf %121 : vector<2x8x8xf32> to vector<2x8x8xbf16>
    "tpu.trace_start"() <{level = 10 : i32, message = "bqk,bkd->bqd"}> : () -> ()
    %cst_46 = arith.constant dense<0.000000e+00> : vector<2x8x8xf32>
    %143 = tpu.matmul %141, %142, %cst_46 {dimension_numbers = #tpu.dot_dimension_numbers<[2], [1], [1], [2], [0, 0, 0, 1, 1, 2], [0], [0]>} : vector<2x8x8xbf16>, vector<2x8x8xbf16>, vector<2x8x8xf32> -> vector<2x8x8xf32>
    "tpu.trace_stop"() : () -> ()
    %144 = vector.shape_cast %143 : vector<2x8x8xf32> to vector<16x8xf32>
    %c24 = arith.constant 24 : index
    %c0_47 = arith.constant 0 : index
    %145 = vector.load %arg6[%c24, %c0_47] : memref<32x32xf32, #tpu.memory_space<vmem>>, vector<8x32xf32>
    %146 = arith.truncf %144 : vector<16x8xf32> to vector<16x8xbf16>
    %147 = arith.truncf %145 : vector<8x32xf32> to vector<8x32xbf16>
    %cst_48 = arith.constant dense<0.000000e+00> : vector<16x32xf32>
    %148 = tpu.matmul %146, %147, %cst_48 {dimension_numbers = #tpu.dot_dimension_numbers<[1], [0], [0], [1], [0, 0, 1, 1], [], []>} : vector<16x8xbf16>, vector<8x32xbf16>, vector<16x32xf32> -> vector<16x32xf32>
    %149 = arith.addf %118, %148 : vector<16x32xf32>
    %c0_49 = arith.constant 0 : index
    %c0_50 = arith.constant 0 : index
    %150 = vector.load %arg7[%c0_49, %c0_50] : memref<1x32xf32, #tpu.memory_space<vmem>>, vector<1x32xf32>
    %151 = vector.broadcast %150 : vector<1x32xf32> to vector<16x32xf32>
    %152 = arith.addf %149, %151 : vector<16x32xf32>
    %153 = arith.addf %0, %152 : vector<16x32xf32>
    %cst_51 = arith.constant dense<0.000000e+00> : vector<16xf32>
    %154 = vector.multi_reduction <add>, %153, %cst_51 [1] : vector<16x32xf32> to vector<16xf32>
    %155 = vector.shape_cast %154 : vector<16xf32> to vector<16x1xf32>
    %cst_52 = arith.constant 3.200000e+01 : f32
    %156 = vector.broadcast %cst_52 : f32 to vector<16x1xf32>
    %157 = arith.divf %155, %156 : vector<16x1xf32>
    %158 = vector.broadcast %157 : vector<16x1xf32> to vector<16x32xf32>
    %159 = arith.subf %153, %158 : vector<16x32xf32>
    %160 = arith.mulf %159, %159 : vector<16x32xf32>
    %cst_53 = arith.constant dense<0.000000e+00> : vector<16xf32>
    %161 = vector.multi_reduction <add>, %160, %cst_53 [1] : vector<16x32xf32> to vector<16xf32>
    %162 = vector.shape_cast %161 : vector<16xf32> to vector<16x1xf32>
    %cst_54 = arith.constant 3.200000e+01 : f32
    %163 = vector.broadcast %cst_54 : f32 to vector<16x1xf32>
    %164 = arith.divf %162, %163 : vector<16x1xf32>
    %165 = vector.broadcast %157 : vector<16x1xf32> to vector<16x32xf32>
    %166 = arith.subf %153, %165 : vector<16x32xf32>
    %cst_55 = arith.constant 9.99999974E-6 : f32
    %167 = vector.broadcast %cst_55 : f32 to vector<16x1xf32>
    %168 = arith.addf %164, %167 : vector<16x1xf32>
    %169 = math.rsqrt %168 : vector<16x1xf32>
    %170 = vector.broadcast %169 : vector<16x1xf32> to vector<16x32xf32>
    %171 = arith.mulf %166, %170 : vector<16x32xf32>
    %c0_56 = arith.constant 0 : index
    %c0_57 = arith.constant 0 : index
    %172 = vector.load %arg9[%c0_56, %c0_57] : memref<1x32xf32, #tpu.memory_space<vmem>>, vector<1x32xf32>
    %173 = vector.broadcast %172 : vector<1x32xf32> to vector<16x32xf32>
    %174 = arith.mulf %171, %173 : vector<16x32xf32>
    %c0_58 = arith.constant 0 : index
    %c0_59 = arith.constant 0 : index
    %175 = vector.load %arg10[%c0_58, %c0_59] : memref<1x32xf32, #tpu.memory_space<vmem>>, vector<1x32xf32>
    %176 = vector.broadcast %175 : vector<1x32xf32> to vector<16x32xf32>
    %177 = arith.addf %174, %176 : vector<16x32xf32>
    %c0_60 = arith.constant 0 : index
    %c0_61 = arith.constant 0 : index
    %178 = vector.load %arg11[%c0_60, %c0_61] : memref<16x32xf32, #tpu.memory_space<vmem>>, vector<16x32xf32>
    tpu.vector_store %arg11[%c0_60, %c0_61], %177 {strides = array<i32>} : memref<16x32xf32, #tpu.memory_space<vmem>>, vector<16x32xf32>,
    return
  }
}

module attributes {stable_mosaic.version = 11 : i64} {
  func.func @_linear_kernel(%arg0: i32, %arg1: i32, %arg2: i32, %arg3: memref<16x32xf32, #tpu.memory_space<vmem>>, %arg4: memref<32x128xf32, #tpu.memory_space<vmem>>, %arg5: memref<1x128xf32, #tpu.memory_space<vmem>>, %arg6: memref<16x128xf32, #tpu.memory_space<vmem>>, %arg7: memref<16x128xf32, #tpu.memory_space<vmem>>) attributes {dimension_semantics = [#tpu.dimension_semantics<parallel>, #tpu.dimension_semantics<parallel>, #tpu.dimension_semantics<arbitrary>], iteration_bounds = array<i64: 1, 1, 1>, scalar_prefetch = 0 : i64, scratch_operands = 1 : i64, tpu.core_type = #tpu.core_type<tc>, window_params = [{transform_indices = @transform_0, window_bounds = array<i64: 16, 32>}, {transform_indices = @transform_1, window_bounds = array<i64: 32, 128>}, {transform_indices = @transform_2, window_bounds = array<i64: 1, 128>}, {transform_indices = @transform_3, window_bounds = array<i64: 16, 128>}]} {
    %c0_i32 = arith.constant 0 : i32
    %0 = arith.cmpi eq, %arg2, %c0_i32 : i32
    %1 = arith.extui %0 : i1 to i32
    %c0_i32_0 = arith.constant 0 : i32
    %2 = arith.cmpi ne, %1, %c0_i32_0 : i32
    scf.if %2 {
      %cst_10 = arith.constant 0.000000e+00 : f32
      %14 = vector.broadcast %cst_10 : f32 to vector<16x128xf32>
      %c0_11 = arith.constant 0 : index
      %c0_12 = arith.constant 0 : index
      %15 = vector.load %arg7[%c0_11, %c0_12] : memref<16x128xf32, #tpu.memory_space<vmem>>, vector<16x128xf32>
      tpu.vector_store %arg7[%c0_11, %c0_12], %14 {strides = array<i32>} : memref<16x128xf32, #tpu.memory_space<vmem>>, vector<16x128xf32>,
    } else {
    }
    %c0 = arith.constant 0 : index
    %c0_1 = arith.constant 0 : index
    %3 = vector.load %arg7[%c0, %c0_1] : memref<16x128xf32, #tpu.memory_space<vmem>>, vector<16x128xf32>
    %c0_2 = arith.constant 0 : index
    %c0_3 = arith.constant 0 : index
    %4 = vector.load %arg3[%c0_2, %c0_3] : memref<16x32xf32, #tpu.memory_space<vmem>>, vector<16x32xf32>
    %c0_4 = arith.constant 0 : index
    %c0_5 = arith.constant 0 : index
    %5 = vector.load %arg4[%c0_4, %c0_5] : memref<32x128xf32, #tpu.memory_space<vmem>>, vector<32x128xf32>
    %6 = arith.truncf %4 : vector<16x32xf32> to vector<16x32xbf16>
    %7 = arith.truncf %5 : vector<32x128xf32> to vector<32x128xbf16>
    %cst = arith.constant dense<0.000000e+00> : vector<16x128xf32>
    %8 = tpu.matmul %6, %7, %cst {dimension_numbers = #tpu.dot_dimension_numbers<[1], [0], [0], [1], [0, 0, 1, 1], [], []>} : vector<16x32xbf16>, vector<32x128xbf16>, vector<16x128xf32> -> vector<16x128xf32>
    %9 = arith.addf %3, %8 : vector<16x128xf32>
    %c0_6 = arith.constant 0 : index
    %c0_7 = arith.constant 0 : index
    %10 = vector.load %arg7[%c0_6, %c0_7] : memref<16x128xf32, #tpu.memory_space<vmem>>, vector<16x128xf32>
    tpu.vector_store %arg7[%c0_6, %c0_7], %9 {strides = array<i32>} : memref<16x128xf32, #tpu.memory_space<vmem>>, vector<16x128xf32>,
    %c0_i32_8 = arith.constant 0 : i32
    %11 = arith.cmpi eq, %arg2, %c0_i32_8 : i32
    %12 = arith.extui %11 : i1 to i32
    %c0_i32_9 = arith.constant 0 : i32
    %13 = arith.cmpi ne, %12, %c0_i32_9 : i32
    scf.if %13 {
      %c0_10 = arith.constant 0 : index
      %c0_11 = arith.constant 0 : index
      %14 = vector.load %arg7[%c0_10, %c0_11] : memref<16x128xf32, #tpu.memory_space<vmem>>, vector<16x128xf32>
      %c0_12 = arith.constant 0 : index
      %c0_13 = arith.constant 0 : index
      %15 = vector.load %arg5[%c0_12, %c0_13] : memref<1x128xf32, #tpu.memory_space<vmem>>, vector<1x128xf32>
      %16 = vector.broadcast %15 : vector<1x128xf32> to vector<16x128xf32>
      %17 = arith.addf %14, %16 : vector<16x128xf32>
      %c0_14 = arith.constant 0 : index
      %c0_15 = arith.constant 0 : index
      %18 = vector.load %arg6[%c0_14, %c0_15] : memref<16x128xf32, #tpu.memory_space<vmem>>, vector<16x128xf32>
      tpu.vector_store %arg6[%c0_14, %c0_15], %17 {strides = array<i32>} : memref<16x128xf32, #tpu.memory_space<vmem>>, vector<16x128xf32>,
    } else {
    }
    return
  }
  func.func @transform_0(%arg0: i32, %arg1: i32, %arg2: i32) -> (i32, i32) {
    %c0_i32 = arith.constant 0 : i32
    return %arg0, %arg2 : i32, i32
  }
  func.func @transform_1(%arg0: i32, %arg1: i32, %arg2: i32) -> (i32, i32) {
    %c0_i32 = arith.constant 0 : i32
    return %arg2, %arg1 : i32, i32
  }
  func.func @transform_2(%arg0: i32, %arg1: i32, %arg2: i32) -> (i32, i32) {
    %c0_i32 = arith.constant 0 : i32
    %c0_i32_0 = arith.constant 0 : i32
    return %c0_i32, %arg1 : i32, i32
  }
  func.func @transform_3(%arg0: i32, %arg1: i32, %arg2: i32) -> (i32, i32) {
    %c0_i32 = arith.constant 0 : i32
    return %arg0, %arg1 : i32, i32
  }
}

</mosaic_0001>

<bundles_post_ra>
// kernel: decoder_forward.9
= control target key start
LH: loop header
LB: loop body
LE: loop exit
PB: predicated region body
PF: predicated region fallthrough
CT: control target
= control target key end

     0   :  { %v248_v0 = vmov 0.0   ;;  %vm249_vm0 = vmmov 0   ;;  %vm43_vm1 = vcmask 261120   ;;  %vm110_vm2 = vcmask 523264   ;;  %s357_s1 = inlined_call_operand.vmem [shape: f32[32,64], index: 1, kind: input, shape index: {}]   ;;  %s358_s3 = inlined_call_operand.vmem [shape: f32[64,32], index: 3, kind: input, shape index: {}]   ;;  %s359_s0 = inlined_call_operand.vmem [shape: f32[16,32], index: 0, kind: input, shape index: {}]   ;;  %s360_s2 = inlined_call_operand.vmem [shape: f32[1,64], index: 2, kind: input, shape index: {}]   ;;  %s361_s4 = inlined_call_operand.vmem [shape: f32[1,32], index: 4, kind: input, shape index: {}]   ;;  %s362_s5 = inlined_call_operand.vmem [shape: f32[1,32], index: 5, kind: input, shape index: {}]   ;;  %s363_s6 = inlined_call_operand.vmem [shape: f32[1,32], index: 6, kind: input, shape index: {}]   ;;  %s364_s7 = inlined_call_operand.vmem [shape: f32[16,32], index: 7, kind: output, shape index: {}]  }
   0x1   :  { %222 = vmatprep.subr.bf16.mxu0 %v248_v0  ;;  %v29_v1 = vld [vmem:[%s357_s1] sm:$0xff]  ;;  %v30_v2 = vld [vmem:[%s357_s1 + $0x8] sm:$0xff]  ;;  %v31_v3 = vld [vmem:[%s357_s1 + $0x10] sm:$0xff]  ;;  %226 = vmatprep.mubr.msk.bf16.mxu0 %vm249_vm0, %v248_v0 }
   0x2   :  { %v34_v4 = vpack.c.bf16 %v30_v2, %v29_v1  ;;  %v32_v5 = vld [vmem:[%s357_s1 + $0x18] sm:$0xff]  ;;  %230 = vmatprep.subr.bf16.mxu1 %v248_v0  ;;  %238 = vmatprep.mubr.msk.bf16.mxu1 %vm249_vm0, %v248_v0  ;;  %v90_v6 = vld [vmem:[%s358_s3] sm:$0xff]  ;;  %v91_v7 = vld [vmem:[%s358_s3 + $0x8] sm:$0xff] }
   0x3   :  { %v92_v8 = vld [vmem:[%s358_s3 + $0x10] sm:$0xff]  ;;  %v35_v9 = vpack.c.bf16 %v32_v5, %v31_v3  ;;  %v27_v10 = vld [vmem:[%s359_s0] sm:$0xff]  ;;  %v28_v11 = vld [vmem:[%s359_s0 + $0x8] sm:$0xff]  ;;  %v99_v12 = vpack.c.bf16 %v91_v7, %v90_v6 }
   0x4   :  { %223 = vmatpush3.bf16.msra.mxu0 %v34_v4  ;;  %v93_v13 = vld [vmem:[%s358_s3 + $0x18] sm:$0xff]  ;;  %v33_v15 = vpack.c.bf16 %v28_v11, %v27_v10  ;;  %v94_v16 = vld [vmem:[%s358_s3 + $0x20] sm:$0xff]  ;;  %v95_v17 = vld [vmem:[%s358_s3 + $0x28] sm:$0xff] }
   0x5   :  { %224 = vmatprep.subr.bf16.mxu0 %v248_v0  ;;  %231 = vmatpush3.bf16.msra.mxu1 %v99_v12  ;;  %v100_v14 = vpack.c.bf16 %v93_v13, %v92_v8  ;;  %v101_v18 = vpack.c.bf16 %v95_v17, %v94_v16  ;;  %v96_v19 = vld [vmem:[%s358_s3 + $0x30] sm:$0xff]  ;;  %v97_v20 = vld [vmem:[%s358_s3 + $0x38] sm:$0xff]  ;;  %v208_v22 = vld [vmem:[%s360_s2] ss:$0 sm:$0xff] }
   0x6   :  { %232 = vmatprep.subr.bf16.mxu1 %v248_v0  ;;  %v102_v21 = vpack.c.bf16 %v97_v20, %v96_v19  ;;  %v210_v32 = vld [vmem:[%s361_s4] ss:$0 sm:$0xff] }
   0x7   :  { %v212_v60 = vld [vmem:[%s362_s5] ss:$0 sm:$0xff] }
   0x8   :  { %225 = vmatpush3.bf16.msra.mxu0 %v35_v9  ;;  %v213_v62 = vld [vmem:[%s363_s6] ss:$0 sm:$0xff] }
   0x9   :  { %233 = vmatpush3.bf16.msra.mxu1 %v100_v14 }
   0xa   :  { %234 = vmatprep.subr.bf16.mxu1 %v248_v0 }
   0xb   :  { %227 = vmatmul.mubr.msk.bf16.vlgmr.msra.gmra.mrb[0].mxu0 %vm43_vm1, %v33_v15 }
   0xd   :  { %235 = vmatpush3.bf16.msra.mxu1 %v101_v18 }
   0xe   :  { %236 = vmatprep.subr.bf16.mxu1 %v248_v0 }
  0x11   :  { %237 = vmatpush3.bf16.msra.mxu1 %v102_v21 }
  0xde   :  { %v81_v23 = vpop.f32.mrb[0].mxu0 }
  0xdf   :  { %v82_v24 = vadd.f32 %v208_v22, %v81_v23  ;;  %v228_v25 = vpop.f32.mrb[1].mxu0 }
  0xe0   :  { %v84_v26 = vpop.f32.mrb[2].mxu0 }
  0xe1   :  { %v85_v27 = vadd.f32 %v208_v22, %v84_v26  ;;  %v229_v28 = vpop.f32.mrb[3].mxu0  ;;  %v88_v29 = vmax.f32 %v82_v24, 0.0 }
  0xe3   :  { %v89_v30 = vmax.f32 %v85_v27, 0.0 }
  0xe5   :  { %v98_v31 = vpack.c.bf16 %v89_v30, %v88_v29 }
  0xe7   :  { %239 = vmatmul.mubr.msk.bf16.vlgmr.msra.gmra.mrb[0].mxu1 %vm110_vm2, %v98_v31 }
 0x1ba   :  { %v148_v33 = vpop.f32.mrb[0].mxu1 }
 0x1bb   :  { %v149_v34 = vadd.f32 %v210_v32, %v148_v33  ;;  %v240_v35 = vpop.f32.mrb[1].mxu1 }
 0x1bc   :  { %v151_v36 = vpop.f32.mrb[2].mxu1 }
 0x1bd   :  { %v152_v37 = vadd.f32 %v210_v32, %v151_v36  ;;  %v241_v38 = vpop.f32.mrb[3].mxu1  ;;  %v155_v39 = vadd.f32 %v149_v34, %v27_v10 }
 0x1bf   :  { %v157_v40 = vsel %vm43_vm1, %v155_v39, 0.0  ;;  %v156_v41 = vadd.f32 %v152_v37, %v28_v11 }
 0x1c0   :  { %158 = vadd.xlane.f32.xlu0 %v157_v40 }
 0x1c1   :  { %v160_v42 = vsel %vm43_vm1, %v156_v41, 0.0 }
 0x1c4   :  { %161 = vadd.xlane.f32.xlu0 %v160_v42 }
 0x24d   :  { %v159_v43 = vpop.xlane.xlu0 %158 }
 0x24e   :  { %v164_v44 = vmul.f32 0.03125, %v159_v43 }
 0x250   :  { %v166_v45 = vsub.f32 %v155_v39, %v164_v44 }
 0x251   :  { %v162_v46 = vpop.xlane.xlu0 %161 }
 0x252   :  { %v165_v47 = vmul.f32 0.03125, %v162_v46  ;;  %v168_v48 = vmul.f32 %v166_v45, %v166_v45 }
 0x254   :  { %v167_v49 = vsub.f32 %v156_v41, %v165_v47  ;;  %v170_v50 = vsel %vm43_vm1, %v168_v48, 0.0 }
 0x255   :  { %171 = vadd.xlane.f32.xlu1 %v170_v50 }
 0x256   :  { %v169_v51 = vmul.f32 %v167_v49, %v167_v49 }
 0x258   :  { %v173_v52 = vsel %vm43_vm1, %v169_v51, 0.0 }
 0x259   :  { %174 = vadd.xlane.f32.xlu1 %v173_v52 }
 0x2e2   :  { %v172_v53 = vpop.xlane.xlu1 %171 }
 0x2e3   :  { %v176_v54 = vmul.f32 0.03125, %v172_v53 }
 0x2e5   :  { %v178_v55 = vadd.f32 1e-05, %v176_v54 }
 0x2e6   :  { %v175_v56 = vpop.xlane.xlu1 %174 }
 0x2e7   :  { %244 = vrsqrt.f32 %v178_v55  ;;  %v177_v57 = vmul.f32 0.03125, %v175_v56 }
 0x2e9   :  { %v179_v58 = vadd.f32 1e-05, %v177_v57 }
 0x2eb   :  { %246 = vrsqrt.f32 %v179_v58 }
 0x2f1   :  { %v245_v59 = vpop.eup %244 }
 0x2f2   :  { %v182_v61 = vmul.f32 %v245_v59, %v166_v45 }
 0x2f4   :  { %v191_v63 = vmul.f32 %v212_v60, %v182_v61 }
 0x2f5   :  { %v247_v0 = vpop.eup %246 }
 0x2f6   :  { %v200_v1 = vadd.f32 %v213_v62, %v191_v63  ;;  %v183_v2 = vmul.f32 %v247_v0, %v167_v49 }
 0x2f8   :  { %202 = vst.msk [vmem:[%s364_s7] sm:$0xff] %vm43_vm1, %v200_v1  ;;  %v192_v3 = vmul.f32 %v212_v60, %v183_v2 }
 0x2fa   :  { %v201_v4 = vadd.f32 %v213_v62, %v192_v3 }
 0x2fc   :  { %203 = vst.msk [vmem:[%s364_s7 + $0x8] sm:$0xff] %vm43_vm1, %v201_v4 }

// kernel: decoder_forward.13
= control target key start
LH: loop header
LB: loop body
LE: loop exit
PB: predicated region body
PF: predicated region fallthrough
CT: control target
= control target key end

     0   :  { %v116_v0 = vmov 0.0   ;;  %vm117_vm0 = vmmov 0   ;;  %vm32_vm1 = vcmask 261120   ;;  %s165_s1 = inlined_call_operand.vmem [shape: f32[32,128], index: 1, kind: input, shape index: {}]   ;;  %s166_s0 = inlined_call_operand.vmem [shape: f32[16,32], index: 0, kind: input, shape index: {}]   ;;  %s167_s2 = inlined_call_operand.vmem [shape: f32[1,128], index: 2, kind: input, shape index: {}]   ;;  %s168_s3 = inlined_call_operand.vmem [shape: f32[16,128], index: 3, kind: output, shape index: {}]  }
   0x1   :  { %106 = vmatprep.subr.bf16.mxu0 %v116_v0  ;;  %v25_v1 = vld [vmem:[%s165_s1] sm:$0xff]  ;;  %v26_v2 = vld [vmem:[%s165_s1 + $0x8] sm:$0xff]  ;;  %v27_v3 = vld [vmem:[%s165_s1 + $0x10] sm:$0xff]  ;;  %110 = vmatprep.mubr.msk.bf16.mxu0 %vm117_vm0, %v116_v0 }
   0x2   :  { %v30_v4 = vpack.c.bf16 %v26_v2, %v25_v1  ;;  %v28_v5 = vld [vmem:[%s165_s1 + $0x18] sm:$0xff]  ;;  %v23_v7 = vld [vmem:[%s166_s0] sm:$0xff]  ;;  %v24_v8 = vld [vmem:[%s166_s0 + $0x8] sm:$0xff] }
   0x3   :  { %v31_v6 = vpack.c.bf16 %v28_v5, %v27_v3  ;;  %v29_v9 = vpack.c.bf16 %v24_v8, %v23_v7  ;;  %v102_v10 = vld [vmem:[%s167_s2] ss:$0 sm:$0xff] }
   0x4   :  { %107 = vmatpush3.bf16.msra.mxu0 %v30_v4 }
   0x5   :  { %108 = vmatprep.subr.bf16.mxu0 %v116_v0 }
   0x8   :  { %109 = vmatpush3.bf16.msra.mxu0 %v31_v6 }
   0xb   :  { %111 = vmatmul.mubr.msk.bf16.vlgmr.msra.gmra.mrb[0].mxu0 %vm32_vm1, %v29_v9 }
  0xde   :  { %v70_v11 = vpop.f32.mrb[0].mxu0 }
  0xdf   :  { %v93_v12 = vadd.f32 %v102_v10, %v70_v11  ;;  %v112_v13 = vpop.f32.mrb[1].mxu0 }
  0xe0   :  { %v73_v14 = vpop.f32.mrb[2].mxu0 }
  0xe1   :  { %95 = vst [vmem:[%s168_s3] sm:$0xff] %v93_v12  ;;  %v94_v15 = vadd.f32 %v102_v10, %v73_v14  ;;  %v113_v16 = vpop.f32.mrb[3].mxu0 }
  0xe3   :  { %96 = vst [vmem:[%s168_s3 + $0x8] sm:$0xff] %v94_v15 }

// kernel: decoder_forward.8
= control target key start
LH: loop header
LB: loop body
LE: loop exit
PB: predicated region body
PF: predicated region fallthrough
CT: control target
= control target key end

     0   :  { %v1567_v0 = vmov 0.0   ;;  %vm1568_vm0 = vmmov 0   ;;  %vm54_vm1 = vcmask 261120   ;;  %vm161_vm2 = vcmask 64512   ;;  %s1571_s17 = smov 88   ;;  %s1572_s18 = smov 112   ;;  %s1899_s4 = inlined_call_operand.vmem [shape: f32[32,64], index: 4, kind: input, shape index: {}]   ;;  %s1900_s2 = inlined_call_operand.vmem [shape: f32[32,32], index: 2, kind: input, shape index: {}]   ;;  %s1901_s1 = inlined_call_operand.vmem [shape: f32[16,32], index: 1, kind: input, shape index: {}]   ;;  %s1902_s0 = inlined_call_operand.vmem [shape: f32[16,32], index: 0, kind: input, shape index: {}]   ;;  %s1903_s5 = inlined_call_operand.vmem [shape: f32[1,64], index: 5, kind: input, shape index: {}]   ;;  %s1904_s3 = inlined_call_operand.vmem [shape: f32[1,32], index: 3, kind: input, shape index: {}]   ;;  %s1905_s6 = inlined_call_operand.vmem [shape: f32[32,32], index: 6, kind: input, shape index: {}]   ;;  %s1906_s7 = inlined_call_operand.vmem [shape: f32[1,32], index: 7, kind: input, shape index: {}]   ;;  %s1907_s8 = inlined_call_operand.vmem [shape: f32[1,32], index: 8, kind: input, shape index: {}]   ;;  %s1908_s9 = inlined_call_operand.vmem [shape: f32[1,32], index: 9, kind: input, shape index: {}]   ;;  %s1909_s10 = inlined_call_operand.vmem [shape: f32[16,32], index: 10, kind: output, shape index: {}]  }
   0x1   :  { %1394 = vmatprep.subr.bf16.mxu1 %v1567_v0  ;;  %v99_v1 = vld [vmem:[%s1899_s4] sm:$0xff]  ;;  %v100_v2 = vld [vmem:[%s1899_s4 + $0x8] sm:$0xff]  ;;  %v101_v3 = vld [vmem:[%s1899_s4 + $0x10] sm:$0xff]  ;;  %1386 = vmatprep.subr.bf16.mxu0 %v1567_v0  ;;  %vm286_vm3 = vcmask 1043456   ;;  %s1573_s23 = smov 80   ;;  %s1574_s24 = smov 104  }
   0x2   :  { %v104_v4 = vpack.c.bf16 %v100_v2, %v99_v1  ;;  %v102_v5 = vld [vmem:[%s1899_s4 + $0x18] sm:$0xff]  ;;  %v40_v6 = vld [vmem:[%s1900_s2] sm:$0xff]  ;;  %v41_v7 = vld [vmem:[%s1900_s2 + $0x8] sm:$0xff]  ;;  %1398 = vmatprep.mubr.msk.bf16.mxu1 %vm1568_vm0, %v1567_v0  ;;  %1390 = vmatprep.mubr.msk.bf16.mxu0 %vm1568_vm0, %v1567_v0  ;;  %s1575_s4 = smov 72  }
   0x3   :  { %v45_v8 = vpack.c.bf16 %v41_v7, %v40_v6  ;;  %v42_v9 = vld [vmem:[%s1900_s2 + $0x10] sm:$0xff]  ;;  %v105_v10 = vpack.c.bf16 %v102_v5, %v101_v3  ;;  %v38_v11 = vld [vmem:[%s1901_s1] sm:$0xff]  ;;  %v39_v12 = vld [vmem:[%s1901_s1 + $0x8] sm:$0xff] }
   0x4   :  { %1395 = vmatpush3.bf16.msra.mxu1 %v104_v4  ;;  %v43_v13 = vld [vmem:[%s1900_s2 + $0x18] sm:$0xff]  ;;  %v1671_v15 = vld [vmem:[%s1902_s0] sm:$0xff]  ;;  %v1676_v16 = vld [vmem:[%s1902_s0 + $0x8] sm:$0xff]  ;;  %v103_v17 = vpack.c.bf16 %v39_v12, %v38_v11 }
   0x5   :  { %1396 = vmatprep.subr.bf16.mxu1 %v1567_v0  ;;  %1387 = vmatpush3.bf16.msra.mxu0 %v45_v8  ;;  %v46_v14 = vpack.c.bf16 %v43_v13, %v42_v9  ;;  %v44_v18 = vpack.c.bf16 %v1676_v16, %v1671_v15  ;;  %v1315_v19 = vld [vmem:[%s1903_s5] ss:$0 sm:$0xff]  ;;  %s1569_s5 = smov 96  }
   0x6   :  { %1388 = vmatprep.subr.bf16.mxu0 %v1567_v0  ;;  %v1313_v25 = vld [vmem:[%s1904_s3] ss:$0 sm:$0xff]  ;;  %s1570_s3 = smov 120  }
   0x8   :  { %1397 = vmatpush3.bf16.msra.mxu1 %v105_v10 }
   0x9   :  { %1389 = vmatpush3.bf16.msra.mxu0 %v46_v14  ;;  %1408 = vmatprep.subr.bf16.mxu1 %v1567_v0 }
   0xa   :  { %1402 = vmatprep.subr.bf16.mxu0 %v1567_v0 }
   0xb   :  { %1399 = vmatmul.mubr.msk.bf16.vlgmr.msra.gmra.mrb[0].mxu1 %vm54_vm1, %v103_v17 }
   0xc   :  { %1391 = vmatmul.mubr.msk.bf16.vlgmr.msra.gmra.mrb[0].mxu0 %vm54_vm1, %v44_v18  ;;  %1410 = vmatprep.mubr.msk.bf16.mxu1 %vm1568_vm0, %v1567_v0 }
   0xd   :  { %1404 = vmatprep.mubr.msk.bf16.mxu0 %vm1568_vm0, %v1567_v0 }
  0xde   :  { %v150_v20 = vpop.f32.mrb[0].mxu1 }
  0xdf   :  { %v151_v21 = vadd.f32 %v1315_v19, %v150_v20  ;;  %v1400_v22 = vpop.f32.mrb[1].mxu1  ;;  %v92_v23 = vpop.f32.mrb[0].mxu0 }
  0xe0   :  { %v153_v24 = vpop.f32.mrb[2].mxu1  ;;  %v1392_v26 = vpop.f32.mrb[1].mxu0  ;;  %v93_v33 = vadd.f32 %v1313_v25, %v92_v23 }
  0xe1   :  { %v1695_v27 = vpack.c.bf16 %v151_v21, %v151_v21  ;;  %v154_v28 = vadd.f32 %v1315_v19, %v153_v24  ;;  %v1401_v29 = vpop.f32.mrb[3].mxu1  ;;  %v95_v30 = vpop.f32.mrb[2].mxu0 }
  0xe2   :  { %v1393_v31 = vpop.f32.mrb[3].mxu0  ;;  %v1706_v36 = vpack.c.bf16 %v93_v33, %v93_v33  ;;  %v96_v37 = vadd.f32 %v1313_v25, %v95_v30 }
  0xe3   :  { %v1697_v32 = vpack.c.bf16 %v154_v28, %v154_v28  ;;  %v166_v34 = vsel %vm161_vm2, %v1695_v27, 0 }
  0xe4   :  { %1403 = vmatpush3.bf16.xpose.msra.mxu0 %v166_v34  ;;  %v1711_v38 = vpack.c.bf16 %v96_v37, %v96_v37 }
  0xe5   :  { %331 = vrot.lane.b32.xlu1 %v1697_v32, %s1569_s5  ;;  %v212_v35 = vsel %vm161_vm2, %v1697_v32, 0  ;;  %1414 = vmatprep.subr.bf16.mxu0 %v1567_v0 }
  0xe6   :  { %1409 = vmatpush3.bf16.xpose.msra.mxu1 %v212_v35 }
  0xe7   :  { %1420 = vmatprep.subr.bf16.mxu1 %v1567_v0 }
  0xe9   :  { %385 = vrot.lane.b32.xlu1 %v1695_v27, %s1570_s3 }
  0xeb   :  { %1405 = vmatmul.mubr.msk.bf16.vlgmr.msra.gmra.mrb[4].mxu0 %vm161_vm2, %v1706_v36 }
  0xec   :  { %1416 = vmatprep.mubr.msk.bf16.mxu0 %vm1568_vm0, %v1567_v0 }
  0xed   :  { %1411 = vmatmul.mubr.msk.bf16.vlgmr.msra.gmra.mrb[4].mxu1 %vm161_vm2, %v1711_v38 }
  0xee   :  { %1422 = vmatprep.mubr.msk.bf16.mxu1 %vm1568_vm0, %v1567_v0 }
 0x157   :  { %v332_v39 = vpop.permute.xlu1 %331 }
 0x158   :  { %v337_v40 = vsel %vm286_vm3, %v332_v39, 0 }
 0x159   :  { %1421 = vmatpush3.bf16.msra.mxu1 %v337_v40 }
 0x15a   :  { %1432 = vmatprep.subr.bf16.mxu1 %v1567_v0 }
 0x15b   :  { %v386_v2 = vpop.permute.xlu1 %385 }
 0x15c   :  { %v391_v9 = vsel %vm161_vm2, %v386_v2, 0 }
 0x1be   :  { %v202_v41 = vpop.f32.mrb[4].mxu0 }
 0x1bf   :  { %v254_v42 = vmul.f32 0.35355338, %v202_v41  ;;  %v1406_v43 = vpop.f32.mrb[5].mxu0 }
 0x1c0   :  { %v205_v44 = vpop.f32.mrb[6].mxu0  ;;  %v248_v45 = vpop.f32.mrb[4].mxu1 }
 0x1c1   :  { %v255_v46 = vmul.f32 0.35355338, %v248_v45  ;;  %v1407_v47 = vpop.f32.mrb[7].mxu0  ;;  %v1412_v48 = vpop.f32.mrb[5].mxu1  ;;  %v256_v49 = vsel %vm161_vm2, %v254_v42, -inf }
 0x1c2   :  { %v251_v50 = vpop.f32.mrb[6].mxu1  ;;  %257 = vmax.xlane.f32.xlu0 %v256_v49 }
 0x1c3   :  { %v1413_v51 = vpop.f32.mrb[7].mxu1  ;;  %v259_v52 = vsel %vm161_vm2, %v255_v46, -inf }
 0x1c6   :  { %260 = vmax.xlane.f32.xlu0 %v259_v52 }
 0x1dc   :  { %281 = vrot.lane.b32.xlu0 %v1695_v27, %s1569_s5 }
 0x1e0   :  { %383 = vrot.lane.b32.xlu0 %v1706_v36, %s1570_s3 }
 0x24f   :  { %v258_v53 = vpop.xlane.xlu0 %257 }
 0x250   :  { %v262_v54 = vsub.f32 %v254_v42, %v258_v53 }
 0x252   :  { %v264_v55 = vmul.f32 1.442695, %v262_v54 }
 0x253   :  { %v261_v56 = vpop.xlane.xlu0 %260 }
 0x254   :  { %1531 = vpow2.f32 %v264_v55  ;;  %v263_v57 = vsub.f32 %v255_v46, %v261_v56 }
 0x256   :  { %v266_v58 = vmul.f32 1.442695, %v263_v57  ;;  %v606_v57 = vld [vmem:[%s1905_s6 + $0x8] sm:$0xff] }
 0x257   :  { %v282_v59 = vpop.permute.xlu0 %281 }
 0x258   :  { %1533 = vpow2.f32 %v266_v58  ;;  %v288_v60 = vsel %vm286_vm3, %v282_v59, 0 }
 0x259   :  { %1415 = vmatpush3.bf16.msra.mxu0 %v288_v60  ;;  %v608_v60 = vpack.c.bf16 %v606_v57, %v606_v57 }
 0x25a   :  { %1426 = vmatprep.subr.bf16.mxu0 %v1567_v0 }
 0x25b   :  { %v384_v14 = vpop.permute.xlu0 %383 }
 0x25e   :  { %v1532_v61 = vpop.eup %1531 }
 0x25f   :  { %v268_v62 = vsel %vm161_vm2, %v1532_v61, 0.0 }
 0x260   :  { %269 = vadd.xlane.f32.xlu1 %v268_v62  ;;  %v379_v62 = vld [vmem:[%s1905_s6] sm:$0xff] }
 0x261   :  { %v381_v2 = vpack.c.bf16 %v379_v62, %v379_v62 }
 0x262   :  { %v1534_v63 = vpop.eup %1533 }
 0x263   :  { %v271_v1 = vsel %vm161_vm2, %v1534_v63, 0.0 }
 0x264   :  { %272 = vadd.xlane.f32.xlu1 %v271_v1 }
 0x275   :  { %436 = vrot.lane.b32.xlu1 %v1697_v32, %s1570_s3 }
 0x279   :  { %434 = vrot.lane.b32.xlu1 %v1711_v38, %s1570_s3 }
 0x2ed   :  { %v270_v3 = vpop.xlane.xlu1 %269 }
 0x2ee   :  { %1535 = vrcp.f32 %v270_v3  ;;  %v613_v3 = vsel %vm286_vm3, %v608_v60, 0 }
 0x2f1   :  { %v273_v4 = vpop.xlane.xlu1 %272 }
 0x2f2   :  { %1537 = vrcp.f32 %v273_v4 }
 0x2f5   :  { %v437_v11 = vpop.permute.xlu1 %436 }
 0x2f6   :  { %v442_v13 = vsel %vm161_vm2, %v437_v11, 0 }
 0x2f8   :  { %v1536_v5 = vpop.eup %1535 }
 0x2f9   :  { %v276_v6 = vmul.f32 %v1536_v5, %v1532_v61  ;;  %v435_v17 = vpop.permute.xlu1 %434 }
 0x2fb   :  { %v278_v7 = vpack.c.bf16 %v276_v6, %v276_v6 }
 0x2fc   :  { %v1538_v8 = vpop.eup %1537 }
 0x2fd   :  { %v277_v10 = vmul.f32 %v1538_v8, %v1534_v63  ;;  %1417 = vmatmul.mubr.msk.bf16.vlgmr.msra.gmra.mrb[8].mxu0 %vm161_vm2, %v278_v7  ;;  %v660_v7 = vsel %vm286_vm3, %v381_v2, 0 }
 0x2fe   :  { %1427 = vmatpush3.bf16.xpose.msra.mxu0 %v391_v9  ;;  %1428 = vmatprep.mubr.msk.bf16.mxu0 %vm1568_vm0, %v1567_v0 }
 0x2ff   :  { %v279_v12 = vpack.c.bf16 %v277_v10, %v277_v10  ;;  %1438 = vmatprep.subr.bf16.mxu0 %v1567_v0 }
 0x301   :  { %1423 = vmatmul.mubr.msk.bf16.vlgmr.msra.gmra.mrb[8].mxu1 %vm161_vm2, %v279_v12 }
 0x302   :  { %1433 = vmatpush3.bf16.xpose.msra.mxu1 %v442_v13  ;;  %1434 = vmatprep.mubr.msk.bf16.mxu1 %vm1568_vm0, %v1567_v0 }
 0x303   :  { %1444 = vmatprep.subr.bf16.mxu1 %v1567_v0 }
 0x305   :  { %1429 = vmatmul.mubr.msk.bf16.vlgmr.msra.gmra.mrb[12].mxu0 %vm161_vm2, %v384_v14 }
 0x306   :  { %1440 = vmatprep.mubr.msk.bf16.mxu0 %vm1568_vm0, %v1567_v0 }
 0x309   :  { %1435 = vmatmul.mubr.msk.bf16.vlgmr.msra.gmra.mrb[12].mxu1 %vm161_vm2, %v435_v17 }
 0x30a   :  { %1446 = vmatprep.mubr.msk.bf16.mxu1 %vm1568_vm0, %v1567_v0 }
 0x3d0   :  { %v1753_v18 = vpop.f32.mrb[8].mxu0 }
 0x3d1   :  { %v1418_v19 = vpop.f32.mrb[9].mxu0 }
 0x3d2   :  { %v327_v20 = vpop.f32.mrb[10].mxu0 }
 0x3d3   :  { %v1419_v21 = vpop.f32.mrb[11].mxu0 }
 0x3d4   :  { %v1755_v22 = vpop.f32.mrb[8].mxu1 }
 0x3d5   :  { %v380_v23 = vpack.c.bf16 %v1755_v22, %v1753_v18  ;;  %v1424_v24 = vpop.f32.mrb[9].mxu1 }
 0x3d6   :  { %v376_v25 = vpop.f32.mrb[10].mxu1 }
 0x3d7   :  { %v1425_v26 = vpop.f32.mrb[11].mxu1 }
 0x3d8   :  { %v427_v28 = vpop.f32.mrb[12].mxu0 }
 0x3d9   :  { %v484_v29 = vmul.f32 0.35355338, %v427_v28  ;;  %v1430_v30 = vpop.f32.mrb[13].mxu0 }
 0x3da   :  { %v430_v31 = vpop.f32.mrb[14].mxu0 }
 0x3db   :  { %v1431_v33 = vpop.f32.mrb[15].mxu0  ;;  %v486_v34 = vsel %vm161_vm2, %v484_v29, -inf }
 0x3dc   :  { %v478_v35 = vpop.f32.mrb[12].mxu1  ;;  %487 = vmax.xlane.f32.xlu0 %v486_v34 }
 0x3dd   :  { %v485_v37 = vmul.f32 0.35355338, %v478_v35  ;;  %v1436_v39 = vpop.f32.mrb[13].mxu1 }
 0x3de   :  { %v481_v40 = vpop.f32.mrb[14].mxu1 }
 0x3df   :  { %v1437_v41 = vpop.f32.mrb[15].mxu1  ;;  %v489_v42 = vsel %vm161_vm2, %v485_v37, -inf }
 0x3e0   :  { %490 = vmax.xlane.f32.xlu1 %v489_v42 }
 0x3f1   :  { %558 = vrot.lane.b32.xlu1 %v1697_v32, %s1571_s17 }
 0x3f5   :  { %705 = vrot.lane.b32.xlu1 %v1695_v27, %s1572_s18 }
 0x3f9   :  { %755 = vrot.lane.b32.xlu1 %v1697_v32, %s1572_s18 }
 0x3fd   :  { %753 = vrot.lane.b32.xlu1 %v1711_v38, %s1572_s18 }
 0x469   :  { %v488_v43 = vpop.xlane.xlu0 %487 }
 0x46a   :  { %v492_v44 = vsub.f32 %v484_v29, %v488_v43 }
 0x46c   :  { %v494_v45 = vmul.f32 1.442695, %v492_v44 }
 0x46d   :  { %v491_v46 = vpop.xlane.xlu1 %490 }
 0x46e   :  { %1539 = vpow2.f32 %v494_v45  ;;  %v493_v47 = vsub.f32 %v485_v37, %v491_v46 }
 0x470   :  { %v496_v48 = vmul.f32 1.442695, %v493_v47 }
 0x471   :  { %v559_v49 = vpop.permute.xlu1 %558 }
 0x472   :  { %1541 = vpow2.f32 %v496_v48  ;;  %v564_v50 = vsel %vm286_vm3, %v559_v49, 0 }
 0x473   :  { %1445 = vmatpush3.bf16.msra.mxu1 %v564_v50 }
 0x474   :  { %1456 = vmatprep.subr.bf16.mxu1 %v1567_v0 }
 0x475   :  { %v706_v8 = vpop.permute.xlu1 %705 }
 0x476   :  { %v711_v22 = vsel %vm161_vm2, %v706_v8, 0 }
 0x478   :  { %v1540_v51 = vpop.eup %1539 }
 0x479   :  { %v498_v52 = vsel %vm161_vm2, %v1540_v51, 0.0  ;;  %v756_v9 = vpop.permute.xlu1 %755 }
 0x47a   :  { %499 = vadd.xlane.f32.xlu0 %v498_v52  ;;  %v761_v10 = vsel %vm161_vm2, %v756_v9, 0 }
 0x47c   :  { %v1542_v53 = vpop.eup %1541 }
 0x47d   :  { %v501_v54 = vsel %vm161_vm2, %v1542_v53, 0.0  ;;  %v754_v11 = vpop.permute.xlu1 %753 }
 0x47e   :  { %502 = vadd.xlane.f32.xlu0 %v501_v54 }
 0x494   :  { %510 = vrot.lane.b32.xlu0 %v1695_v27, %s1571_s17 }
 0x498   :  { %703 = vrot.lane.b32.xlu0 %v1706_v36, %s1572_s18 }
 0x507   :  { %v500_v55 = vpop.xlane.xlu0 %499 }
 0x508   :  { %1543 = vrcp.f32 %v500_v55 }
 0x50b   :  { %v503_v56 = vpop.xlane.xlu0 %502 }
 0x50c   :  { %1545 = vrcp.f32 %v503_v56 }
 0x50f   :  { %v511_v58 = vpop.permute.xlu0 %510 }
 0x510   :  { %v516_v59 = vsel %vm286_vm3, %v511_v58, 0 }
 0x511   :  { %1439 = vmatpush3.bf16.msra.mxu0 %v516_v59 }
 0x512   :  { %v1544_v61 = vpop.eup %1543  ;;  %1450 = vmatprep.subr.bf16.mxu0 %v1567_v0 }
 0x513   :  { %v506_v63 = vmul.f32 %v1544_v61, %v1540_v51  ;;  %v704_v26 = vpop.permute.xlu0 %703 }
 0x515   :  { %v508_v1 = vpack.c.bf16 %v506_v63, %v506_v63 }
 0x516   :  { %v1546_v4 = vpop.eup %1545 }
 0x517   :  { %v507_v5 = vmul.f32 %v1546_v4, %v1542_v53  ;;  %1441 = vmatmul.mubr.msk.bf16.vlgmr.msra.gmra.mrb[16].mxu0 %vm161_vm2, %v508_v1 }
 0x518   :  { %1451 = vmatpush3.bf16.msra.mxu0 %v613_v3  ;;  %1452 = vmatprep.mubr.msk.bf16.mxu0 %vm1568_vm0, %v1567_v0 }
 0x519   :  { %v509_v6 = vpack.c.bf16 %v507_v5, %v507_v5  ;;  %1462 = vmatprep.subr.bf16.mxu0 %v1567_v0 }
 0x51b   :  { %1447 = vmatmul.mubr.msk.bf16.vlgmr.msra.gmra.mrb[16].mxu1 %vm161_vm2, %v509_v6 }
 0x51c   :  { %1457 = vmatpush3.bf16.msra.mxu1 %v660_v7  ;;  %1458 = vmatprep.mubr.msk.bf16.mxu1 %vm1568_vm0, %v1567_v0 }
 0x51d   :  { %1468 = vmatprep.subr.bf16.mxu1 %v1567_v0 }
 0x523   :  { %1459 = vmatmul.mubr.msk.bf16.vlgmr.msra.gmra.mrb[20].mxu1 %vm161_vm2, %v380_v23 }
 0x524   :  { %1470 = vmatprep.mubr.msk.bf16.mxu1 %vm1568_vm0, %v1567_v0 }
 0x525   :  { %1469 = vmatpush3.bf16.xpose.msra.mxu1 %v761_v10 }
 0x526   :  { %1480 = vmatprep.subr.bf16.mxu1 %v1567_v0 }
 0x52c   :  { %1471 = vmatmul.mubr.msk.bf16.vlgmr.msra.gmra.mrb[24].mxu1 %vm161_vm2, %v754_v11 }
 0x52d   :  { %1482 = vmatprep.mubr.msk.bf16.mxu1 %vm1568_vm0, %v1567_v0 }
 0x5ea   :  { %v552_v12 = vpop.f32.mrb[16].mxu0 }
 0x5eb   :  { %v1442_v13 = vpop.f32.mrb[17].mxu0 }
 0x5ec   :  { %v555_v14 = vpop.f32.mrb[18].mxu0 }
 0x5ed   :  { %v1443_v17 = vpop.f32.mrb[19].mxu0 }
 0x5ee   :  { %v600_v18 = vpop.f32.mrb[16].mxu1  ;;  %v925_v17 = vld [vmem:[%s1905_s6 + $0x10] sm:$0xff] }
 0x5ef   :  { %v607_v19 = vpack.c.bf16 %v600_v18, %v552_v12  ;;  %v1448_v20 = vpop.f32.mrb[17].mxu1  ;;  %v927_v18 = vpack.c.bf16 %v925_v17, %v925_v17 }
 0x5f0   :  { %v603_v21 = vpop.f32.mrb[18].mxu1 }
 0x5f1   :  { %v1449_v23 = vpop.f32.mrb[19].mxu1  ;;  %1453 = vmatmul.mubr.msk.bf16.vlgmr.msra.gmra.mrb[20].mxu0 %vm161_vm2, %v607_v19  ;;  %v932_v19 = vsel %vm286_vm3, %v927_v18, 0 }
 0x5f2   :  { %1463 = vmatpush3.bf16.xpose.msra.mxu0 %v711_v22  ;;  %1464 = vmatprep.mubr.msk.bf16.mxu0 %vm1568_vm0, %v1567_v0 }
 0x5f3   :  { %1474 = vmatprep.subr.bf16.mxu0 %v1567_v0 }
 0x5f6   :  { %v696_v24 = vpop.f32.mrb[20].mxu1 }
 0x5f7   :  { %v1460_v25 = vpop.f32.mrb[21].mxu1 }
 0x5f8   :  { %v699_v28 = vpop.f32.mrb[22].mxu1 }
 0x5f9   :  { %v1461_v29 = vpop.f32.mrb[23].mxu1  ;;  %1465 = vmatmul.mubr.msk.bf16.vlgmr.msra.gmra.mrb[24].mxu0 %vm161_vm2, %v704_v26 }
 0x5fa   :  { %1476 = vmatprep.mubr.msk.bf16.mxu0 %vm1568_vm0, %v1567_v0 }
 0x5ff   :  { %v797_v30 = vpop.f32.mrb[24].mxu1 }
 0x600   :  { %v804_v31 = vmul.f32 0.35355338, %v797_v30  ;;  %v1472_v33 = vpop.f32.mrb[25].mxu1 }
 0x601   :  { %v800_v34 = vpop.f32.mrb[26].mxu1 }
 0x602   :  { %v1473_v35 = vpop.f32.mrb[27].mxu1  ;;  %v808_v37 = vsel %vm161_vm2, %v804_v31, -inf }
 0x603   :  { %809 = vmax.xlane.f32.xlu1 %v808_v37 }
 0x614   :  { %877 = vrot.lane.b32.xlu1 %v1697_v32, %s1573_s23 }
 0x618   :  { %979 = vrot.lane.b32.xlu1 %v1695_v27, %s1574_s24 }
 0x61c   :  { %1029 = vrot.lane.b32.xlu1 %v1697_v32, %s1574_s24 }
 0x620   :  { %1027 = vrot.lane.b32.xlu1 %v1711_v38, %s1574_s24 }
 0x690   :  { %v810_v39 = vpop.xlane.xlu1 %809 }
 0x691   :  { %v812_v42 = vsub.f32 %v804_v31, %v810_v39 }
 0x693   :  { %v815_v43 = vmul.f32 1.442695, %v812_v42 }
 0x694   :  { %v878_v40 = vpop.permute.xlu1 %877 }
 0x695   :  { %v883_v41 = vsel %vm286_vm3, %v878_v40, 0  ;;  %1547 = vpow2.f32 %v815_v43 }
 0x696   :  { %1481 = vmatpush3.bf16.msra.mxu1 %v883_v41 }
 0x697   :  { %1492 = vmatprep.subr.bf16.mxu1 %v1567_v0 }
 0x698   :  { %v980_v2 = vpop.permute.xlu1 %979 }
 0x699   :  { %v985_v4 = vsel %vm161_vm2, %v980_v2, 0 }
 0x69c   :  { %v1030_v26 = vpop.permute.xlu1 %1029 }
 0x69d   :  { %v1035_v33 = vsel %vm161_vm2, %v1030_v26, 0 }
 0x69f   :  { %v1548_v55 = vpop.eup %1547 }
 0x6a0   :  { %v820_v56 = vsel %vm161_vm2, %v1548_v55, 0.0  ;;  %v1028_v35 = vpop.permute.xlu1 %1027 }
 0x6c4   :  { %v649_v44 = vpop.f32.mrb[20].mxu0 }
 0x6c5   :  { %v1819_v45 = vadd.f32 %v696_v24, %v649_v44  ;;  %v1454_v46 = vpop.f32.mrb[21].mxu0 }
 0x6c6   :  { %v652_v47 = vpop.f32.mrb[22].mxu0 }
 0x6c7   :  { %v1821_v48 = vadd.f32 %v699_v28, %v652_v47  ;;  %v1455_v49 = vpop.f32.mrb[23].mxu0 }
 0x6cc   :  { %v747_v50 = vpop.f32.mrb[24].mxu0 }
 0x6cd   :  { %v803_v38 = vmul.f32 0.35355338, %v747_v50  ;;  %v1466_v51 = vpop.f32.mrb[25].mxu0 }
 0x6ce   :  { %v750_v52 = vpop.f32.mrb[26].mxu0 }
 0x6cf   :  { %v1467_v53 = vpop.f32.mrb[27].mxu0  ;;  %v805_v54 = vsel %vm161_vm2, %v803_v38, -inf }
 0x6d0   :  { %806 = vmax.xlane.f32.xlu0 %v805_v54 }
 0x6d4   :  { %821 = vadd.xlane.f32.xlu0 %v820_v56 }
 0x75d   :  { %v807_v57 = vpop.xlane.xlu0 %806 }
 0x75e   :  { %v811_v58 = vsub.f32 %v803_v38, %v807_v57 }
 0x760   :  { %v813_v59 = vmul.f32 1.442695, %v811_v58 }
 0x761   :  { %v822_v60 = vpop.xlane.xlu0 %821 }
 0x762   :  { %1549 = vpow2.f32 %v813_v59 }
 0x763   :  { %1551 = vrcp.f32 %v822_v60 }
 0x76c   :  { %v1550_v61 = vpop.eup %1549 }
 0x76d   :  { %v1552_v62 = vpop.eup %1551  ;;  %v817_v63 = vsel %vm161_vm2, %v1550_v61, 0.0 }
 0x76e   :  { %v826_v1 = vmul.f32 %v1552_v62, %v1548_v55  ;;  %818 = vadd.xlane.f32.xlu0 %v817_v63 }
 0x770   :  { %v828_v3 = vpack.c.bf16 %v826_v1, %v826_v1 }
 0x772   :  { %1483 = vmatmul.mubr.msk.bf16.vlgmr.msra.gmra.mrb[28].mxu1 %vm161_vm2, %v828_v3 }
 0x773   :  { %1493 = vmatpush3.bf16.xpose.msra.mxu1 %v985_v4  ;;  %1494 = vmatprep.mubr.msk.bf16.mxu1 %vm1568_vm0, %v1567_v0 }
 0x774   :  { %1504 = vmatprep.subr.bf16.mxu1 %v1567_v0 }
 0x784   :  { %829 = vrot.lane.b32.xlu0 %v1695_v27, %s1573_s23 }
 0x788   :  { %977 = vrot.lane.b32.xlu0 %v1706_v36, %s1574_s24 }
 0x7fb   :  { %v819_v5 = vpop.xlane.xlu0 %818 }
 0x7fc   :  { %1553 = vrcp.f32 %v819_v5 }
 0x7ff   :  { %v830_v6 = vpop.permute.xlu0 %829 }
 0x800   :  { %v835_v7 = vsel %vm286_vm3, %v830_v6, 0  ;;  %v1199_v6 = vld [vmem:[%s1905_s6 + $0x18] sm:$0xff] }
 0x801   :  { %1475 = vmatpush3.bf16.msra.mxu0 %v835_v7  ;;  %v1201_v7 = vpack.c.bf16 %v1199_v6, %v1199_v6 }
 0x802   :  { %1486 = vmatprep.subr.bf16.mxu0 %v1567_v0 }
 0x803   :  { %v978_v8 = vpop.permute.xlu0 %977 }
 0x804   :  { %1495 = vmatmul.mubr.msk.bf16.vlgmr.msra.gmra.mrb[32].mxu1 %vm161_vm2, %v978_v8  ;;  %v1206_v8 = vsel %vm286_vm3, %v1201_v7, 0 }
 0x805   :  { %1506 = vmatprep.mubr.msk.bf16.mxu1 %vm1568_vm0, %v1567_v0 }
 0x806   :  { %v1554_v9 = vpop.eup %1553 }
 0x807   :  { %v825_v10 = vmul.f32 %v1554_v9, %v1550_v61 }
 0x809   :  { %v827_v11 = vpack.c.bf16 %v825_v10, %v825_v10 }
 0x80b   :  { %1477 = vmatmul.mubr.msk.bf16.vlgmr.msra.gmra.mrb[28].mxu0 %vm161_vm2, %v827_v11 }
 0x80c   :  { %1488 = vmatprep.mubr.msk.bf16.mxu0 %vm1568_vm0, %v1567_v0  ;;  %1487 = vmatpush3.bf16.msra.mxu0 %v932_v19  ;;  %v1337_v19 = vld [vmem:[%s1906_s7] ss:$0 sm:$0xff] }
 0x80d   :  { %1498 = vmatprep.subr.bf16.mxu0 %v1567_v0 }
 0x845   :  { %v919_v36 = vpop.f32.mrb[28].mxu1 }
 0x846   :  { %v1484_v12 = vpop.f32.mrb[29].mxu1 }
 0x847   :  { %v922_v13 = vpop.f32.mrb[30].mxu1 }
 0x848   :  { %v1485_v14 = vpop.f32.mrb[31].mxu1 }
 0x8d7   :  { %v1021_v20 = vpop.f32.mrb[32].mxu1 }
 0x8d8   :  { %v1077_v21 = vmul.f32 0.35355338, %v1021_v20  ;;  %v1496_v22 = vpop.f32.mrb[33].mxu1 }
 0x8d9   :  { %v1024_v23 = vpop.f32.mrb[34].mxu1 }
 0x8da   :  { %v1497_v24 = vpop.f32.mrb[35].mxu1  ;;  %v1079_v25 = vsel %vm161_vm2, %v1077_v21, -inf }
 0x8db   :  { %1080 = vmax.xlane.f32.xlu0 %v1079_v25 }
 0x8de   :  { %v871_v28 = vpop.f32.mrb[28].mxu0 }
 0x8df   :  { %v926_v29 = vpack.c.bf16 %v919_v36, %v871_v28  ;;  %v1478_v30 = vpop.f32.mrb[29].mxu0 }
 0x8e0   :  { %v874_v31 = vpop.f32.mrb[30].mxu0 }
 0x8e1   :  { %v1479_v34 = vpop.f32.mrb[31].mxu0  ;;  %1489 = vmatmul.mubr.msk.bf16.vlgmr.msra.gmra.mrb[32].mxu0 %vm161_vm2, %v926_v29 }
 0x8e2   :  { %1499 = vmatpush3.bf16.xpose.msra.mxu0 %v1035_v33  ;;  %1500 = vmatprep.mubr.msk.bf16.mxu0 %vm1568_vm0, %v1567_v0 }
 0x8e3   :  { %1510 = vmatprep.subr.bf16.mxu0 %v1567_v0 }
 0x8e9   :  { %1501 = vmatmul.mubr.msk.bf16.vlgmr.msra.gmra.mrb[36].mxu0 %vm161_vm2, %v1028_v35 }
 0x8ea   :  { %1512 = vmatprep.mubr.msk.bf16.mxu0 %vm1568_vm0, %v1567_v0 }
 0x968   :  { %v1081_v37 = vpop.xlane.xlu0 %1080 }
 0x969   :  { %v1085_v39 = vsub.f32 %v1077_v21, %v1081_v37 }
 0x96b   :  { %v1087_v40 = vmul.f32 1.442695, %v1085_v39 }
 0x96d   :  { %1555 = vpow2.f32 %v1087_v40 }
 0x977   :  { %v1556_v41 = vpop.eup %1555 }
 0x978   :  { %v1091_v42 = vsel %vm161_vm2, %v1556_v41, 0.0 }
 0x979   :  { %1092 = vadd.xlane.f32.xlu0 %v1091_v42 }
 0x9b4   :  { %v968_v43 = vpop.f32.mrb[32].mxu0 }
 0x9b5   :  { %v975_v44 = vadd.f32 %v968_v43, %v1819_v45  ;;  %v1490_v46 = vpop.f32.mrb[33].mxu0 }
 0x9b6   :  { %v971_v47 = vpop.f32.mrb[34].mxu0 }
 0x9b7   :  { %v976_v49 = vadd.f32 %v971_v47, %v1821_v48  ;;  %v1491_v50 = vpop.f32.mrb[35].mxu0 }
 0x9bc   :  { %v1071_v38 = vpop.f32.mrb[36].mxu0 }
 0x9bd   :  { %v1078_v51 = vmul.f32 0.35355338, %v1071_v38  ;;  %v1502_v52 = vpop.f32.mrb[37].mxu0 }
 0x9be   :  { %v1074_v53 = vpop.f32.mrb[38].mxu0 }
 0x9bf   :  { %v1503_v54 = vpop.f32.mrb[39].mxu0  ;;  %v1082_v55 = vsel %vm161_vm2, %v1078_v51, -inf }
 0x9c0   :  { %1083 = vmax.xlane.f32.xlu1 %v1082_v55  ;;  %v1339_v54 = vld [vmem:[%s1908_s9] ss:$0 sm:$0xff] }
 0x9d1   :  { %1151 = vrot.lane.b32.xlu1 %v1697_v32, %s1575_s4 }
 0xa06   :  { %v1093_v61 = vpop.xlane.xlu0 %1092 }
 0xa4d   :  { %v1084_v56 = vpop.xlane.xlu1 %1083 }
 0xa4e   :  { %v1086_v57 = vsub.f32 %v1078_v51, %v1084_v56  ;;  %v1338_v51 = vld [vmem:[%s1907_s8] ss:$0 sm:$0xff] }
 0xa50   :  { %v1089_v58 = vmul.f32 1.442695, %v1086_v57 }
 0xa51   :  { %v1152_v45 = vpop.permute.xlu1 %1151 }
 0xa52   :  { %1557 = vpow2.f32 %v1089_v58  ;;  %v1157_v59 = vsel %vm286_vm3, %v1152_v45, 0 }
 0xa53   :  { %1511 = vmatpush3.bf16.msra.mxu0 %v1157_v59  ;;  %1559 = vrcp.f32 %v1093_v61 }
 0xa5c   :  { %v1558_v48 = vpop.eup %1557 }
 0xa5d   :  { %v1094_v60 = vsel %vm161_vm2, %v1558_v48, 0.0  ;;  %v1560_v62 = vpop.eup %1559 }
 0xa5e   :  { %1095 = vadd.xlane.f32.xlu0 %v1094_v60  ;;  %v1099_v32 = vmul.f32 %v1560_v62, %v1556_v41 }
 0xa60   :  { %v1101_v3 = vpack.c.bf16 %v1099_v32, %v1099_v32 }
 0xa74   :  { %1103 = vrot.lane.b32.xlu0 %v1695_v27, %s1575_s4 }
 0xaeb   :  { %v1096_v63 = vpop.xlane.xlu0 %1095 }
 0xaec   :  { %1561 = vrcp.f32 %v1096_v63 }
 0xaef   :  { %v1104_v1 = vpop.permute.xlu0 %1103 }
 0xaf0   :  { %v1109_v2 = vsel %vm286_vm3, %v1104_v1, 0 }
 0xaf1   :  { %1505 = vmatpush3.bf16.msra.mxu1 %v1109_v2 }
 0xaf2   :  { %1516 = vmatprep.subr.bf16.mxu1 %v1567_v0 }
 0xaf4   :  { %1507 = vmatmul.mubr.msk.bf16.vlgmr.msra.gmra.mrb[36].mxu1 %vm161_vm2, %v1101_v3 }
 0xaf5   :  { %1518 = vmatprep.mubr.msk.bf16.mxu1 %vm1568_vm0, %v1567_v0  ;;  %1517 = vmatpush3.bf16.msra.mxu1 %v1206_v8 }
 0xaf6   :  { %v1562_v4 = vpop.eup %1561 }
 0xaf7   :  { %v1100_v27 = vmul.f32 %v1562_v4, %v1558_v48 }
 0xaf9   :  { %v1102_v5 = vpack.c.bf16 %v1100_v27, %v1100_v27 }
 0xafb   :  { %1513 = vmatmul.mubr.msk.bf16.vlgmr.msra.gmra.mrb[40].mxu0 %vm161_vm2, %v1102_v5 }
 0xbc7   :  { %v1145_v9 = vpop.f32.mrb[36].mxu1 }
 0xbc8   :  { %v1508_v10 = vpop.f32.mrb[37].mxu1 }
 0xbc9   :  { %v1148_v11 = vpop.f32.mrb[38].mxu1 }
 0xbca   :  { %v1509_v36 = vpop.f32.mrb[39].mxu1 }
 0xbce   :  { %v1193_v12 = vpop.f32.mrb[40].mxu0 }
 0xbcf   :  { %v1200_v13 = vpack.c.bf16 %v1193_v12, %v1145_v9  ;;  %v1514_v0 = vpop.f32.mrb[41].mxu0 }
 0xbd0   :  { %v1196_v14 = vpop.f32.mrb[42].mxu0 }
 0xbd1   :  { %v1515_v17 = vpop.f32.mrb[43].mxu0  ;;  %1519 = vmatmul.mubr.msk.bf16.vlgmr.msra.gmra.mrb[40].mxu1 %vm161_vm2, %v1200_v13 }
 0xca4   :  { %v1242_v18 = vpop.f32.mrb[40].mxu1 }
 0xca5   :  { %v1249_v20 = vadd.f32 %v1242_v18, %v975_v44  ;;  %v1520_v21 = vpop.f32.mrb[41].mxu1 }
 0xca6   :  { %v1245_v22 = vpop.f32.mrb[42].mxu1 }
 0xca7   :  { %v1258_v23 = vadd.f32 %v1337_v19, %v1249_v20  ;;  %v1250_v24 = vadd.f32 %v1245_v22, %v976_v49  ;;  %v1521_v25 = vpop.f32.mrb[43].mxu1 }
 0xca9   :  { %v1259_v26 = vadd.f32 %v1337_v19, %v1250_v24  ;;  %v1260_v28 = vadd.f32 %v1258_v23, %v1671_v15 }
 0xcab   :  { %v1262_v29 = vsel %vm54_vm1, %v1260_v28, 0.0  ;;  %v1261_v30 = vadd.f32 %v1259_v26, %v1676_v16 }
 0xcac   :  { %1263 = vadd.xlane.f32.xlu1 %v1262_v29 }
 0xcad   :  { %v1265_v31 = vsel %vm54_vm1, %v1261_v30, 0.0 }
 0xcae   :  { %1266 = vadd.xlane.f32.xlu0 %v1265_v31 }
 0xd39   :  { %v1264_v33 = vpop.xlane.xlu1 %1263 }
 0xd3a   :  { %v1269_v34 = vmul.f32 0.03125, %v1264_v33 }
 0xd3b   :  { %v1267_v35 = vpop.xlane.xlu0 %1266 }
 0xd3c   :  { %v1271_v37 = vsub.f32 %v1260_v28, %v1269_v34  ;;  %v1270_v39 = vmul.f32 0.03125, %v1267_v35 }
 0xd3e   :  { %v1272_v40 = vsub.f32 %v1261_v30, %v1270_v39  ;;  %v1273_v41 = vmul.f32 %v1271_v37, %v1271_v37 }
 0xd40   :  { %v1275_v42 = vsel %vm54_vm1, %v1273_v41, 0.0  ;;  %v1274_v43 = vmul.f32 %v1272_v40, %v1272_v40 }
 0xd41   :  { %1276 = vadd.xlane.f32.xlu0 %v1275_v42 }
 0xd42   :  { %v1278_v15 = vsel %vm54_vm1, %v1274_v43, 0.0 }
 0xd43   :  { %1279 = vadd.xlane.f32.xlu1 %v1278_v15 }
 0xdce   :  { %v1277_v44 = vpop.xlane.xlu0 %1276 }
 0xdcf   :  { %v1281_v16 = vmul.f32 0.03125, %v1277_v44 }
 0xdd0   :  { %v1280_v46 = vpop.xlane.xlu1 %1279 }
 0xdd1   :  { %v1283_v47 = vadd.f32 1e-05, %v1281_v16  ;;  %v1282_v49 = vmul.f32 0.03125, %v1280_v46 }
 0xdd3   :  { %1563 = vrsqrt.f32 %v1283_v47  ;;  %v1284_v50 = vadd.f32 1e-05, %v1282_v49 }
 0xdd5   :  { %1565 = vrsqrt.f32 %v1284_v50 }
 0xddd   :  { %v1564_v38 = vpop.eup %1563 }
 0xdde   :  { %v1287_v52 = vmul.f32 %v1564_v38, %v1271_v37 }
 0xddf   :  { %v1566_v53 = vpop.eup %1565 }
 0xde0   :  { %v1296_v55 = vmul.f32 %v1338_v51, %v1287_v52  ;;  %v1288_v56 = vmul.f32 %v1566_v53, %v1272_v40 }
 0xde2   :  { %v1305_v57 = vadd.f32 %v1339_v54, %v1296_v55  ;;  %v1297_v58 = vmul.f32 %v1338_v51, %v1288_v56 }
 0xde4   :  { %1307 = vst.msk [vmem:[%s1909_s10] sm:$0xff] %vm54_vm1, %v1305_v57  ;;  %v1306_v45 = vadd.f32 %v1339_v54, %v1297_v58 }
 0xde6   :  { %1308 = vst.msk [vmem:[%s1909_s10 + $0x8] sm:$0xff] %vm54_vm1, %v1306_v45 }

// kernel: decoder_forward.7
= control target key start
LH: loop header
LB: loop body
LE: loop exit
PB: predicated region body
PF: predicated region fallthrough
CT: control target
= control target key end

     0   :  { %v1582_v0 = vmov 0.0   ;;  %vm1583_vm0 = vmmov 0   ;;  %vm57_vm1 = vcmask 261120   ;;  %vm166_vm2 = vcmask 64512   ;;  %s1587_s24 = smov 112   ;;  %s1588_s29 = smov 80   ;;  %s1941_s4 = inlined_call_operand.vmem [shape: f32[32,64], index: 4, kind: input, shape index: {}]   ;;  %s1942_s2 = inlined_call_operand.vmem [shape: f32[32,32], index: 2, kind: input, shape index: {}]   ;;  %s1943_s1 = inlined_call_operand.vmem [shape: f32[16,32], index: 1, kind: input, shape index: {}, may-alias: {0,1}]   ;;  %s1944_s0 = inlined_call_operand.vmem [shape: f32[16,32], index: 0, kind: input, shape index: {}, may-alias: {0,1}]   ;;  %s1945_s5 = inlined_call_operand.vmem [shape: f32[1,64], index: 5, kind: input, shape index: {}]   ;;  %s1946_s3 = inlined_call_operand.vmem [shape: f32[1,32], index: 3, kind: input, shape index: {}]   ;;  %s1947_s8 = inlined_call_operand.vmem [shape: f32[8,8], index: 8, kind: input, shape index: {}]   ;;  %s1948_s6 = inlined_call_operand.vmem [shape: f32[32,32], index: 6, kind: input, shape index: {}]   ;;  %s1949_s7 = inlined_call_operand.vmem [shape: f32[1,32], index: 7, kind: input, shape index: {}]   ;;  %s1950_s9 = inlined_call_operand.vmem [shape: f32[1,32], index: 9, kind: input, shape index: {}]   ;;  %s1951_s10 = inlined_call_operand.vmem [shape: f32[1,32], index: 10, kind: input, shape index: {}]   ;;  %s1952_s11 = inlined_call_operand.vmem [shape: f32[16,32], index: 11, kind: output, shape index: {}]  }
   0x1   :  { %1409 = vmatprep.subr.bf16.mxu1 %v1582_v0  ;;  %v102_v1 = vld [vmem:[%s1941_s4] sm:$0xff]  ;;  %v103_v2 = vld [vmem:[%s1941_s4 + $0x8] sm:$0xff]  ;;  %v104_v3 = vld [vmem:[%s1941_s4 + $0x10] sm:$0xff]  ;;  %1401 = vmatprep.subr.bf16.mxu0 %v1582_v0  ;;  %vm295_vm3 = vcmask 1043456   ;;  %s1589_s30 = smov 104   ;;  %s1590_s13 = smov 72  }
   0x2   :  { %v107_v4 = vpack.c.bf16 %v103_v2, %v102_v1  ;;  %v105_v5 = vld [vmem:[%s1941_s4 + $0x18] sm:$0xff]  ;;  %v43_v6 = vld [vmem:[%s1942_s2] sm:$0xff]  ;;  %v44_v7 = vld [vmem:[%s1942_s2 + $0x8] sm:$0xff]  ;;  %1413 = vmatprep.mubr.msk.bf16.mxu1 %vm1583_vm0, %v1582_v0  ;;  %1405 = vmatprep.mubr.msk.bf16.mxu0 %vm1583_vm0, %v1582_v0 }
   0x3   :  { %v48_v8 = vpack.c.bf16 %v44_v7, %v43_v6  ;;  %v45_v9 = vld [vmem:[%s1942_s2 + $0x10] sm:$0xff]  ;;  %v108_v10 = vpack.c.bf16 %v105_v5, %v104_v3  ;;  %v41_v11 = vld [vmem:[%s1943_s1] sm:$0xff]  ;;  %v42_v12 = vld [vmem:[%s1943_s1 + $0x8] sm:$0xff] }
   0x4   :  { %1410 = vmatpush3.bf16.msra.mxu1 %v107_v4  ;;  %v46_v13 = vld [vmem:[%s1942_s2 + $0x18] sm:$0xff]  ;;  %v1691_v15 = vld [vmem:[%s1944_s0] sm:$0xff]  ;;  %v1696_v16 = vld [vmem:[%s1944_s0 + $0x8] sm:$0xff]  ;;  %v106_v17 = vpack.c.bf16 %v42_v12, %v41_v11 }
   0x5   :  { %1411 = vmatprep.subr.bf16.mxu1 %v1582_v0  ;;  %1402 = vmatpush3.bf16.msra.mxu0 %v48_v8  ;;  %v49_v14 = vpack.c.bf16 %v46_v13, %v45_v9  ;;  %v47_v18 = vpack.c.bf16 %v1696_v16, %v1691_v15  ;;  %v1330_v19 = vld [vmem:[%s1945_s5] ss:$0 sm:$0xff]  ;;  %s1584_s5 = smov 96  }
   0x6   :  { %1403 = vmatprep.subr.bf16.mxu0 %v1582_v0  ;;  %v1328_v25 = vld [vmem:[%s1946_s3] ss:$0 sm:$0xff]  ;;  %s1585_s3 = smov 120  }
   0x7   :  { %v1746_v41 = vld [vmem:[%s1947_s8] sm:$0xff]  ;;  %s1586_s8 = smov 88  }
   0x8   :  { %1412 = vmatpush3.bf16.msra.mxu1 %v108_v10  ;;  %vm161_vm4 = vcmp.gt.f32.partialorder %v1746_v41, 0.0 }
   0x9   :  { %1404 = vmatpush3.bf16.msra.mxu0 %v49_v14  ;;  %1423 = vmatprep.subr.bf16.mxu1 %v1582_v0 }
   0xa   :  { %1417 = vmatprep.subr.bf16.mxu0 %v1582_v0 }
   0xb   :  { %1414 = vmatmul.mubr.msk.bf16.vlgmr.msra.gmra.mrb[0].mxu1 %vm57_vm1, %v106_v17 }
   0xc   :  { %1406 = vmatmul.mubr.msk.bf16.vlgmr.msra.gmra.mrb[0].mxu0 %vm57_vm1, %v47_v18  ;;  %1425 = vmatprep.mubr.msk.bf16.mxu1 %vm1583_vm0, %v1582_v0 }
   0xd   :  { %1419 = vmatprep.mubr.msk.bf16.mxu0 %vm1583_vm0, %v1582_v0 }
  0xde   :  { %v153_v20 = vpop.f32.mrb[0].mxu1 }
  0xdf   :  { %v154_v21 = vadd.f32 %v1330_v19, %v153_v20  ;;  %v1415_v22 = vpop.f32.mrb[1].mxu1  ;;  %v95_v23 = vpop.f32.mrb[0].mxu0 }
  0xe0   :  { %v156_v24 = vpop.f32.mrb[2].mxu1  ;;  %v1407_v26 = vpop.f32.mrb[1].mxu0  ;;  %v96_v33 = vadd.f32 %v1328_v25, %v95_v23 }
  0xe1   :  { %v1715_v27 = vpack.c.bf16 %v154_v21, %v154_v21  ;;  %v157_v28 = vadd.f32 %v1330_v19, %v156_v24  ;;  %v1416_v29 = vpop.f32.mrb[3].mxu1  ;;  %v98_v30 = vpop.f32.mrb[2].mxu0 }
  0xe2   :  { %v1408_v31 = vpop.f32.mrb[3].mxu0  ;;  %v1726_v36 = vpack.c.bf16 %v96_v33, %v96_v33  ;;  %v99_v37 = vadd.f32 %v1328_v25, %v98_v30 }
  0xe3   :  { %v1717_v32 = vpack.c.bf16 %v157_v28, %v157_v28  ;;  %v171_v34 = vsel %vm166_vm2, %v1715_v27, 0 }
  0xe4   :  { %1418 = vmatpush3.bf16.xpose.msra.mxu0 %v171_v34  ;;  %v1731_v38 = vpack.c.bf16 %v99_v37, %v99_v37 }
  0xe5   :  { %340 = vrot.lane.b32.xlu1 %v1717_v32, %s1584_s5  ;;  %v217_v35 = vsel %vm166_vm2, %v1717_v32, 0  ;;  %1429 = vmatprep.subr.bf16.mxu0 %v1582_v0 }
  0xe6   :  { %1424 = vmatpush3.bf16.xpose.msra.mxu1 %v217_v35 }
  0xe7   :  { %1435 = vmatprep.subr.bf16.mxu1 %v1582_v0 }
  0xe9   :  { %394 = vrot.lane.b32.xlu1 %v1715_v27, %s1585_s3 }
  0xeb   :  { %1420 = vmatmul.mubr.msk.bf16.vlgmr.msra.gmra.mrb[4].mxu0 %vm166_vm2, %v1726_v36 }
  0xec   :  { %1431 = vmatprep.mubr.msk.bf16.mxu0 %vm1583_vm0, %v1582_v0 }
  0xed   :  { %1426 = vmatmul.mubr.msk.bf16.vlgmr.msra.gmra.mrb[4].mxu1 %vm166_vm2, %v1731_v38 }
  0xee   :  { %1437 = vmatprep.mubr.msk.bf16.mxu1 %vm1583_vm0, %v1582_v0 }
 0x157   :  { %v341_v39 = vpop.permute.xlu1 %340 }
 0x158   :  { %v346_v40 = vsel %vm295_vm3, %v341_v39, 0 }
 0x159   :  { %1436 = vmatpush3.bf16.msra.mxu1 %v346_v40 }
 0x15a   :  { %1447 = vmatprep.subr.bf16.mxu1 %v1582_v0 }
 0x15b   :  { %v395_v5 = vpop.permute.xlu1 %394 }
 0x15c   :  { %v400_v12 = vsel %vm166_vm2, %v395_v5, 0  ;;  %v388_v5 = vld [vmem:[%s1948_s6] sm:$0xff] }
 0x1be   :  { %v207_v42 = vpop.f32.mrb[4].mxu0 }
 0x1bf   :  { %v259_v43 = vmul.f32 0.35355338, %v207_v42  ;;  %v1421_v44 = vpop.f32.mrb[5].mxu0 }
 0x1c0   :  { %v210_v45 = vpop.f32.mrb[6].mxu0  ;;  %v253_v46 = vpop.f32.mrb[4].mxu1 }
 0x1c1   :  { %v260_v47 = vmul.f32 0.35355338, %v253_v46  ;;  %v1422_v48 = vpop.f32.mrb[7].mxu0  ;;  %v1427_v49 = vpop.f32.mrb[5].mxu1  ;;  %v263_v50 = vsel %vm161_vm4, %v259_v43, -1e+09 }
 0x1c2   :  { %v256_v51 = vpop.f32.mrb[6].mxu1  ;;  %v265_v52 = vsel %vm166_vm2, %v263_v50, -inf }
 0x1c3   :  { %v1428_v53 = vpop.f32.mrb[7].mxu1  ;;  %266 = vmax.xlane.f32.xlu0 %v265_v52  ;;  %v264_v54 = vsel %vm161_vm4, %v260_v47, -1e+09 }
 0x1c4   :  { %v268_v55 = vsel %vm166_vm2, %v264_v54, -inf }
 0x1c7   :  { %269 = vmax.xlane.f32.xlu0 %v268_v55 }
 0x1dd   :  { %290 = vrot.lane.b32.xlu0 %v1715_v27, %s1584_s5 }
 0x1e1   :  { %392 = vrot.lane.b32.xlu0 %v1726_v36, %s1585_s3 }
 0x250   :  { %v267_v56 = vpop.xlane.xlu0 %266 }
 0x251   :  { %v271_v57 = vsub.f32 %v263_v50, %v267_v56 }
 0x253   :  { %v273_v58 = vmul.f32 1.442695, %v271_v57 }
 0x254   :  { %v270_v59 = vpop.xlane.xlu0 %269 }
 0x255   :  { %1546 = vpow2.f32 %v273_v58  ;;  %v272_v60 = vsub.f32 %v264_v54, %v270_v59 }
 0x257   :  { %v275_v61 = vmul.f32 1.442695, %v272_v60 }
 0x258   :  { %v291_v62 = vpop.permute.xlu0 %290 }
 0x259   :  { %1548 = vpow2.f32 %v275_v61  ;;  %v297_v63 = vsel %vm295_vm3, %v291_v62, 0 }
 0x25a   :  { %1430 = vmatpush3.bf16.msra.mxu0 %v297_v63  ;;  %v617_v63 = vld [vmem:[%s1948_s6 + $0x8] sm:$0xff] }
 0x25b   :  { %1441 = vmatprep.subr.bf16.mxu0 %v1582_v0 }
 0x25c   :  { %v393_v19 = vpop.permute.xlu0 %392 }
 0x25f   :  { %v1547_v1 = vpop.eup %1546 }
 0x260   :  { %v277_v2 = vsel %vm166_vm2, %v1547_v1, 0.0 }
 0x261   :  { %278 = vadd.xlane.f32.xlu1 %v277_v2 }
 0x263   :  { %v1549_v3 = vpop.eup %1548 }
 0x264   :  { %v280_v4 = vsel %vm166_vm2, %v1549_v3, 0.0 }
 0x265   :  { %281 = vadd.xlane.f32.xlu1 %v280_v4 }
 0x276   :  { %445 = vrot.lane.b32.xlu1 %v1717_v32, %s1585_s3 }
 0x27a   :  { %443 = vrot.lane.b32.xlu1 %v1731_v38, %s1585_s3 }
 0x2ee   :  { %v279_v6 = vpop.xlane.xlu1 %278 }
 0x2ef   :  { %1550 = vrcp.f32 %v279_v6 }
 0x2f2   :  { %v282_v7 = vpop.xlane.xlu1 %281 }
 0x2f3   :  { %1552 = vrcp.f32 %v282_v7 }
 0x2f6   :  { %v446_v14 = vpop.permute.xlu1 %445 }
 0x2f7   :  { %v451_v18 = vsel %vm166_vm2, %v446_v14, 0 }
 0x2f9   :  { %v1551_v8 = vpop.eup %1550 }
 0x2fa   :  { %v285_v9 = vmul.f32 %v1551_v8, %v1547_v1  ;;  %v444_v20 = vpop.permute.xlu1 %443  ;;  %v390_v8 = vpack.c.bf16 %v388_v5, %v388_v5 }
 0x2fc   :  { %v287_v10 = vpack.c.bf16 %v285_v9, %v285_v9 }
 0x2fd   :  { %v1553_v11 = vpop.eup %1552 }
 0x2fe   :  { %v286_v13 = vmul.f32 %v1553_v11, %v1549_v3  ;;  %1432 = vmatmul.mubr.msk.bf16.vlgmr.msra.gmra.mrb[8].mxu0 %vm166_vm2, %v287_v10  ;;  %v619_v3 = vpack.c.bf16 %v617_v63, %v617_v63 }
 0x2ff   :  { %1442 = vmatpush3.bf16.xpose.msra.mxu0 %v400_v12  ;;  %1443 = vmatprep.mubr.msk.bf16.mxu0 %vm1583_vm0, %v1582_v0 }
 0x300   :  { %v288_v17 = vpack.c.bf16 %v286_v13, %v286_v13  ;;  %1453 = vmatprep.subr.bf16.mxu0 %v1582_v0  ;;  %v624_v9 = vsel %vm295_vm3, %v619_v3, 0  ;;  %v671_v13 = vsel %vm295_vm3, %v390_v8, 0 }
 0x302   :  { %1438 = vmatmul.mubr.msk.bf16.vlgmr.msra.gmra.mrb[8].mxu1 %vm166_vm2, %v288_v17 }
 0x303   :  { %1448 = vmatpush3.bf16.xpose.msra.mxu1 %v451_v18  ;;  %1449 = vmatprep.mubr.msk.bf16.mxu1 %vm1583_vm0, %v1582_v0 }
 0x304   :  { %1459 = vmatprep.subr.bf16.mxu1 %v1582_v0 }
 0x306   :  { %1444 = vmatmul.mubr.msk.bf16.vlgmr.msra.gmra.mrb[12].mxu0 %vm166_vm2, %v393_v19 }
 0x307   :  { %1455 = vmatprep.mubr.msk.bf16.mxu0 %vm1583_vm0, %v1582_v0 }
 0x30a   :  { %1450 = vmatmul.mubr.msk.bf16.vlgmr.msra.gmra.mrb[12].mxu1 %vm166_vm2, %v444_v20 }
 0x30b   :  { %1461 = vmatprep.mubr.msk.bf16.mxu1 %vm1583_vm0, %v1582_v0 }
 0x3d1   :  { %v1783_v21 = vpop.f32.mrb[8].mxu0 }
 0x3d2   :  { %v1433_v22 = vpop.f32.mrb[9].mxu0 }
 0x3d3   :  { %v336_v23 = vpop.f32.mrb[10].mxu0 }
 0x3d4   :  { %v1434_v24 = vpop.f32.mrb[11].mxu0 }
 0x3d5   :  { %v1785_v25 = vpop.f32.mrb[8].mxu1 }
 0x3d6   :  { %v389_v26 = vpack.c.bf16 %v1785_v25, %v1783_v21  ;;  %v1439_v28 = vpop.f32.mrb[9].mxu1 }
 0x3d7   :  { %v385_v29 = vpop.f32.mrb[10].mxu1 }
 0x3d8   :  { %v1440_v30 = vpop.f32.mrb[11].mxu1 }
 0x3d9   :  { %v436_v31 = vpop.f32.mrb[12].mxu0 }
 0x3da   :  { %v493_v33 = vmul.f32 0.35355338, %v436_v31  ;;  %v1445_v34 = vpop.f32.mrb[13].mxu0 }
 0x3db   :  { %v439_v35 = vpop.f32.mrb[14].mxu0 }
 0x3dc   :  { %v1446_v37 = vpop.f32.mrb[15].mxu0  ;;  %v495_v39 = vsel %vm161_vm4, %v493_v33, -1e+09 }
 0x3dd   :  { %v487_v40 = vpop.f32.mrb[12].mxu1  ;;  %v497_v42 = vsel %vm166_vm2, %v495_v39, -inf }
 0x3de   :  { %v494_v43 = vmul.f32 0.35355338, %v487_v40  ;;  %v1451_v44 = vpop.f32.mrb[13].mxu1  ;;  %498 = vmax.xlane.f32.xlu0 %v497_v42 }
 0x3df   :  { %v490_v45 = vpop.f32.mrb[14].mxu1 }
 0x3e0   :  { %v1452_v46 = vpop.f32.mrb[15].mxu1  ;;  %v496_v47 = vsel %vm161_vm4, %v494_v43, -1e+09 }
 0x3e1   :  { %v500_v48 = vsel %vm166_vm2, %v496_v47, -inf }
 0x3e2   :  { %501 = vmax.xlane.f32.xlu1 %v500_v48 }
 0x3f3   :  { %569 = vrot.lane.b32.xlu1 %v1717_v32, %s1586_s8 }
 0x3f7   :  { %716 = vrot.lane.b32.xlu1 %v1715_v27, %s1587_s24 }
 0x3fb   :  { %766 = vrot.lane.b32.xlu1 %v1717_v32, %s1587_s24 }
 0x3ff   :  { %764 = vrot.lane.b32.xlu1 %v1731_v38, %s1587_s24 }
 0x46b   :  { %v499_v49 = vpop.xlane.xlu0 %498 }
 0x46c   :  { %v503_v50 = vsub.f32 %v495_v39, %v499_v49 }
 0x46e   :  { %v505_v51 = vmul.f32 1.442695, %v503_v50 }
 0x46f   :  { %v502_v52 = vpop.xlane.xlu1 %501 }
 0x470   :  { %1554 = vpow2.f32 %v505_v51  ;;  %v504_v53 = vsub.f32 %v496_v47, %v502_v52 }
 0x472   :  { %v507_v54 = vmul.f32 1.442695, %v504_v53 }
 0x473   :  { %v570_v55 = vpop.permute.xlu1 %569 }
 0x474   :  { %1556 = vpow2.f32 %v507_v54  ;;  %v575_v56 = vsel %vm295_vm3, %v570_v55, 0 }
 0x475   :  { %1460 = vmatpush3.bf16.msra.mxu1 %v575_v56 }
 0x476   :  { %1471 = vmatprep.subr.bf16.mxu1 %v1582_v0 }
 0x477   :  { %v717_v14 = vpop.permute.xlu1 %716 }
 0x478   :  { %v722_v29 = vsel %vm166_vm2, %v717_v14, 0 }
 0x47a   :  { %v1555_v57 = vpop.eup %1554 }
 0x47b   :  { %v509_v58 = vsel %vm166_vm2, %v1555_v57, 0.0  ;;  %v767_v17 = vpop.permute.xlu1 %766 }
 0x47c   :  { %510 = vadd.xlane.f32.xlu0 %v509_v58  ;;  %v772_v18 = vsel %vm166_vm2, %v767_v17, 0 }
 0x47e   :  { %v1557_v59 = vpop.eup %1556 }
 0x47f   :  { %v512_v60 = vsel %vm166_vm2, %v1557_v59, 0.0  ;;  %v765_v19 = vpop.permute.xlu1 %764 }
 0x480   :  { %513 = vadd.xlane.f32.xlu0 %v512_v60 }
 0x496   :  { %521 = vrot.lane.b32.xlu0 %v1715_v27, %s1586_s8 }
 0x49a   :  { %714 = vrot.lane.b32.xlu0 %v1726_v36, %s1587_s24 }
 0x509   :  { %v511_v61 = vpop.xlane.xlu0 %510 }
 0x50a   :  { %1558 = vrcp.f32 %v511_v61 }
 0x50d   :  { %v514_v62 = vpop.xlane.xlu0 %513 }
 0x50e   :  { %1560 = vrcp.f32 %v514_v62 }
 0x511   :  { %v522_v1 = vpop.permute.xlu0 %521 }
 0x512   :  { %v527_v2 = vsel %vm295_vm3, %v522_v1, 0 }
 0x513   :  { %1454 = vmatpush3.bf16.msra.mxu0 %v527_v2 }
 0x514   :  { %v1559_v4 = vpop.eup %1558  ;;  %1465 = vmatprep.subr.bf16.mxu0 %v1582_v0 }
 0x515   :  { %v517_v6 = vmul.f32 %v1559_v4, %v1555_v57  ;;  %v715_v34 = vpop.permute.xlu0 %714 }
 0x517   :  { %v519_v7 = vpack.c.bf16 %v517_v6, %v517_v6 }
 0x518   :  { %v1561_v10 = vpop.eup %1560 }
 0x519   :  { %v518_v11 = vmul.f32 %v1561_v10, %v1557_v59  ;;  %1456 = vmatmul.mubr.msk.bf16.vlgmr.msra.gmra.mrb[16].mxu0 %vm166_vm2, %v519_v7 }
 0x51a   :  { %1466 = vmatpush3.bf16.msra.mxu0 %v624_v9  ;;  %1467 = vmatprep.mubr.msk.bf16.mxu0 %vm1583_vm0, %v1582_v0 }
 0x51b   :  { %v520_v12 = vpack.c.bf16 %v518_v11, %v518_v11  ;;  %1477 = vmatprep.subr.bf16.mxu0 %v1582_v0 }
 0x51d   :  { %1462 = vmatmul.mubr.msk.bf16.vlgmr.msra.gmra.mrb[16].mxu1 %vm166_vm2, %v520_v12 }
 0x51e   :  { %1472 = vmatpush3.bf16.msra.mxu1 %v671_v13  ;;  %1473 = vmatprep.mubr.msk.bf16.mxu1 %vm1583_vm0, %v1582_v0 }
 0x51f   :  { %1483 = vmatprep.subr.bf16.mxu1 %v1582_v0 }
 0x525   :  { %1474 = vmatmul.mubr.msk.bf16.vlgmr.msra.gmra.mrb[20].mxu1 %vm166_vm2, %v389_v26 }
 0x526   :  { %1485 = vmatprep.mubr.msk.bf16.mxu1 %vm1583_vm0, %v1582_v0 }
 0x527   :  { %1484 = vmatpush3.bf16.xpose.msra.mxu1 %v772_v18 }
 0x528   :  { %1495 = vmatprep.subr.bf16.mxu1 %v1582_v0 }
 0x52e   :  { %1486 = vmatmul.mubr.msk.bf16.vlgmr.msra.gmra.mrb[24].mxu1 %vm166_vm2, %v765_v19 }
 0x52f   :  { %1497 = vmatprep.mubr.msk.bf16.mxu1 %vm1583_vm0, %v1582_v0 }
 0x5ec   :  { %v563_v20 = vpop.f32.mrb[16].mxu0 }
 0x5ed   :  { %v1457_v22 = vpop.f32.mrb[17].mxu0 }
 0x5ee   :  { %v566_v23 = vpop.f32.mrb[18].mxu0 }
 0x5ef   :  { %v1458_v21 = vpop.f32.mrb[19].mxu0 }
 0x5f0   :  { %v611_v24 = vpop.f32.mrb[16].mxu1 }
 0x5f1   :  { %v618_v25 = vpack.c.bf16 %v611_v24, %v563_v20  ;;  %v1463_v26 = vpop.f32.mrb[17].mxu1 }
 0x5f2   :  { %v614_v28 = vpop.f32.mrb[18].mxu1  ;;  %v938_v26 = vld [vmem:[%s1948_s6 + $0x10] sm:$0xff] }
 0x5f3   :  { %v1464_v30 = vpop.f32.mrb[19].mxu1  ;;  %1468 = vmatmul.mubr.msk.bf16.vlgmr.msra.gmra.mrb[20].mxu0 %vm166_vm2, %v618_v25  ;;  %v940_v28 = vpack.c.bf16 %v938_v26, %v938_v26 }
 0x5f4   :  { %1478 = vmatpush3.bf16.xpose.msra.mxu0 %v722_v29  ;;  %1479 = vmatprep.mubr.msk.bf16.mxu0 %vm1583_vm0, %v1582_v0 }
 0x5f5   :  { %1489 = vmatprep.subr.bf16.mxu0 %v1582_v0  ;;  %v945_v29 = vsel %vm295_vm3, %v940_v28, 0 }
 0x5f8   :  { %v707_v31 = vpop.f32.mrb[20].mxu1 }
 0x5f9   :  { %v1475_v33 = vpop.f32.mrb[21].mxu1 }
 0x5fa   :  { %v710_v35 = vpop.f32.mrb[22].mxu1 }
 0x5fb   :  { %v1476_v37 = vpop.f32.mrb[23].mxu1  ;;  %1480 = vmatmul.mubr.msk.bf16.vlgmr.msra.gmra.mrb[24].mxu0 %vm166_vm2, %v715_v34 }
 0x5fc   :  { %1491 = vmatprep.mubr.msk.bf16.mxu0 %vm1583_vm0, %v1582_v0 }
 0x601   :  { %v808_v39 = vpop.f32.mrb[24].mxu1 }
 0x602   :  { %v815_v40 = vmul.f32 0.35355338, %v808_v39  ;;  %v1487_v42 = vpop.f32.mrb[25].mxu1 }
 0x603   :  { %v811_v43 = vpop.f32.mrb[26].mxu1 }
 0x604   :  { %v1488_v44 = vpop.f32.mrb[27].mxu1  ;;  %v817_v45 = vsel %vm161_vm4, %v815_v40, -1e+09 }
 0x605   :  { %v821_v46 = vsel %vm166_vm2, %v817_v45, -inf }
 0x606   :  { %822 = vmax.xlane.f32.xlu1 %v821_v46 }
 0x617   :  { %890 = vrot.lane.b32.xlu1 %v1717_v32, %s1588_s29 }
 0x61b   :  { %992 = vrot.lane.b32.xlu1 %v1715_v27, %s1589_s30 }
 0x61f   :  { %1042 = vrot.lane.b32.xlu1 %v1717_v32, %s1589_s30 }
 0x623   :  { %1040 = vrot.lane.b32.xlu1 %v1731_v38, %s1589_s30 }
 0x693   :  { %v823_v47 = vpop.xlane.xlu1 %822 }
 0x694   :  { %v825_v50 = vsub.f32 %v817_v45, %v823_v47 }
 0x696   :  { %v828_v51 = vmul.f32 1.442695, %v825_v50 }
 0x697   :  { %v891_v48 = vpop.permute.xlu1 %890 }
 0x698   :  { %v896_v49 = vsel %vm295_vm3, %v891_v48, 0  ;;  %1562 = vpow2.f32 %v828_v51 }
 0x699   :  { %1496 = vmatpush3.bf16.msra.mxu1 %v896_v49 }
 0x69a   :  { %1507 = vmatprep.subr.bf16.mxu1 %v1582_v0 }
 0x69b   :  { %v993_v11 = vpop.permute.xlu1 %992 }
 0x69c   :  { %v998_v13 = vsel %vm166_vm2, %v993_v11, 0 }
 0x69f   :  { %v1043_v40 = vpop.permute.xlu1 %1042 }
 0x6a0   :  { %v1048_v46 = vsel %vm166_vm2, %v1043_v40, 0 }
 0x6a2   :  { %v1563_v1 = vpop.eup %1562 }
 0x6a3   :  { %v833_v2 = vsel %vm166_vm2, %v1563_v1, 0.0  ;;  %v1041_v48 = vpop.permute.xlu1 %1040 }
 0x6c6   :  { %v660_v52 = vpop.f32.mrb[20].mxu0 }
 0x6c7   :  { %v1855_v53 = vadd.f32 %v707_v31, %v660_v52  ;;  %v1469_v54 = vpop.f32.mrb[21].mxu0 }
 0x6c8   :  { %v663_v55 = vpop.f32.mrb[22].mxu0 }
 0x6c9   :  { %v1857_v56 = vadd.f32 %v710_v35, %v663_v55  ;;  %v1470_v57 = vpop.f32.mrb[23].mxu0 }
 0x6ce   :  { %v758_v58 = vpop.f32.mrb[24].mxu0 }
 0x6cf   :  { %v814_v38 = vmul.f32 0.35355338, %v758_v58  ;;  %v1481_v59 = vpop.f32.mrb[25].mxu0 }
 0x6d0   :  { %v761_v60 = vpop.f32.mrb[26].mxu0 }
 0x6d1   :  { %v1482_v61 = vpop.f32.mrb[27].mxu0  ;;  %v816_v62 = vsel %vm161_vm4, %v814_v38, -1e+09 }
 0x6d2   :  { %v818_v63 = vsel %vm166_vm2, %v816_v62, -inf }
 0x6d3   :  { %819 = vmax.xlane.f32.xlu0 %v818_v63 }
 0x6d7   :  { %834 = vadd.xlane.f32.xlu0 %v833_v2 }
 0x760   :  { %v820_v3 = vpop.xlane.xlu0 %819 }
 0x761   :  { %v824_v4 = vsub.f32 %v816_v62, %v820_v3 }
 0x763   :  { %v826_v5 = vmul.f32 1.442695, %v824_v4 }
 0x764   :  { %v835_v6 = vpop.xlane.xlu0 %834 }
 0x765   :  { %1564 = vpow2.f32 %v826_v5 }
 0x766   :  { %1566 = vrcp.f32 %v835_v6 }
 0x76f   :  { %v1565_v7 = vpop.eup %1564 }
 0x770   :  { %v1567_v8 = vpop.eup %1566  ;;  %v830_v9 = vsel %vm166_vm2, %v1565_v7, 0.0 }
 0x771   :  { %v839_v10 = vmul.f32 %v1567_v8, %v1563_v1  ;;  %831 = vadd.xlane.f32.xlu0 %v830_v9 }
 0x773   :  { %v841_v12 = vpack.c.bf16 %v839_v10, %v839_v10 }
 0x775   :  { %1498 = vmatmul.mubr.msk.bf16.vlgmr.msra.gmra.mrb[28].mxu1 %vm166_vm2, %v841_v12 }
 0x776   :  { %1508 = vmatpush3.bf16.xpose.msra.mxu1 %v998_v13  ;;  %1509 = vmatprep.mubr.msk.bf16.mxu1 %vm1583_vm0, %v1582_v0 }
 0x777   :  { %1519 = vmatprep.subr.bf16.mxu1 %v1582_v0 }
 0x787   :  { %842 = vrot.lane.b32.xlu0 %v1715_v27, %s1588_s29 }
 0x78b   :  { %990 = vrot.lane.b32.xlu0 %v1726_v36, %s1589_s30 }
 0x7fe   :  { %v832_v14 = vpop.xlane.xlu0 %831 }
 0x7ff   :  { %1568 = vrcp.f32 %v832_v14 }
 0x802   :  { %v843_v17 = vpop.permute.xlu0 %842 }
 0x803   :  { %v848_v18 = vsel %vm295_vm3, %v843_v17, 0 }
 0x804   :  { %1490 = vmatpush3.bf16.msra.mxu0 %v848_v18 }
 0x805   :  { %1501 = vmatprep.subr.bf16.mxu0 %v1582_v0 }
 0x806   :  { %v991_v19 = vpop.permute.xlu0 %990 }
 0x807   :  { %1510 = vmatmul.mubr.msk.bf16.vlgmr.msra.gmra.mrb[32].mxu1 %vm166_vm2, %v991_v19  ;;  %v1214_v19 = vld [vmem:[%s1948_s6 + $0x18] sm:$0xff] }
 0x808   :  { %1521 = vmatprep.mubr.msk.bf16.mxu1 %vm1583_vm0, %v1582_v0 }
 0x809   :  { %v1569_v20 = vpop.eup %1568 }
 0x80a   :  { %v838_v22 = vmul.f32 %v1569_v20, %v1565_v7  ;;  %v1216_v20 = vpack.c.bf16 %v1214_v19, %v1214_v19 }
 0x80c   :  { %v840_v23 = vpack.c.bf16 %v838_v22, %v838_v22  ;;  %v1221_v22 = vsel %vm295_vm3, %v1216_v20, 0 }
 0x80e   :  { %1492 = vmatmul.mubr.msk.bf16.vlgmr.msra.gmra.mrb[28].mxu0 %vm166_vm2, %v840_v23 }
 0x80f   :  { %1503 = vmatprep.mubr.msk.bf16.mxu0 %vm1583_vm0, %v1582_v0  ;;  %1502 = vmatpush3.bf16.msra.mxu0 %v945_v29 }
 0x810   :  { %1513 = vmatprep.subr.bf16.mxu0 %v1582_v0 }
 0x848   :  { %v932_v36 = vpop.f32.mrb[28].mxu1 }
 0x849   :  { %v1499_v21 = vpop.f32.mrb[29].mxu1 }
 0x84a   :  { %v935_v24 = vpop.f32.mrb[30].mxu1 }
 0x84b   :  { %v1500_v25 = vpop.f32.mrb[31].mxu1 }
 0x8da   :  { %v1034_v30 = vpop.f32.mrb[32].mxu1 }
 0x8db   :  { %v1090_v31 = vmul.f32 0.35355338, %v1034_v30  ;;  %v1511_v33 = vpop.f32.mrb[33].mxu1 }
 0x8dc   :  { %v1037_v34 = vpop.f32.mrb[34].mxu1 }
 0x8dd   :  { %v1512_v35 = vpop.f32.mrb[35].mxu1  ;;  %v1092_v37 = vsel %vm161_vm4, %v1090_v31, -1e+09  ;;  %v1352_v31 = vld [vmem:[%s1949_s7] ss:$0 sm:$0xff] }
 0x8de   :  { %v1094_v39 = vsel %vm166_vm2, %v1092_v37, -inf }
 0x8df   :  { %1095 = vmax.xlane.f32.xlu0 %v1094_v39 }
 0x8e1   :  { %v884_v42 = vpop.f32.mrb[28].mxu0 }
 0x8e2   :  { %v939_v43 = vpack.c.bf16 %v932_v36, %v884_v42  ;;  %v1493_v44 = vpop.f32.mrb[29].mxu0 }
 0x8e3   :  { %v887_v45 = vpop.f32.mrb[30].mxu0 }
 0x8e4   :  { %v1494_v47 = vpop.f32.mrb[31].mxu0  ;;  %1504 = vmatmul.mubr.msk.bf16.vlgmr.msra.gmra.mrb[32].mxu0 %vm166_vm2, %v939_v43 }
 0x8e5   :  { %1514 = vmatpush3.bf16.xpose.msra.mxu0 %v1048_v46  ;;  %1515 = vmatprep.mubr.msk.bf16.mxu0 %vm1583_vm0, %v1582_v0 }
 0x8e6   :  { %1525 = vmatprep.subr.bf16.mxu0 %v1582_v0 }
 0x8ec   :  { %1516 = vmatmul.mubr.msk.bf16.vlgmr.msra.gmra.mrb[36].mxu0 %vm166_vm2, %v1041_v48 }
 0x8ed   :  { %1527 = vmatprep.mubr.msk.bf16.mxu0 %vm1583_vm0, %v1582_v0 }
 0x96c   :  { %v1096_v49 = vpop.xlane.xlu0 %1095 }
 0x96d   :  { %v1100_v50 = vsub.f32 %v1092_v37, %v1096_v49 }
 0x96f   :  { %v1102_v51 = vmul.f32 1.442695, %v1100_v50 }
 0x971   :  { %1570 = vpow2.f32 %v1102_v51 }
 0x97b   :  { %v1571_v52 = vpop.eup %1570 }
 0x97c   :  { %v1106_v54 = vsel %vm166_vm2, %v1571_v52, 0.0 }
 0x97d   :  { %1107 = vadd.xlane.f32.xlu0 %v1106_v54 }
 0x9b7   :  { %v981_v55 = vpop.f32.mrb[32].mxu0 }
 0x9b8   :  { %v988_v57 = vadd.f32 %v981_v55, %v1855_v53  ;;  %v1505_v58 = vpop.f32.mrb[33].mxu0 }
 0x9b9   :  { %v984_v38 = vpop.f32.mrb[34].mxu0 }
 0x9ba   :  { %v989_v59 = vadd.f32 %v984_v38, %v1857_v56  ;;  %v1506_v60 = vpop.f32.mrb[35].mxu0 }
 0x9bf   :  { %v1084_v61 = vpop.f32.mrb[36].mxu0 }
 0x9c0   :  { %v1091_v62 = vmul.f32 0.35355338, %v1084_v61  ;;  %v1517_v63 = vpop.f32.mrb[37].mxu0 }
 0x9c1   :  { %v1087_v1 = vpop.f32.mrb[38].mxu0  ;;  %v1353_v63 = vld [vmem:[%s1950_s9] ss:$0 sm:$0xff] }
 0x9c2   :  { %v1518_v2 = vpop.f32.mrb[39].mxu0  ;;  %v1093_v3 = vsel %vm161_vm4, %v1091_v62, -1e+09 }
 0x9c3   :  { %v1097_v4 = vsel %vm166_vm2, %v1093_v3, -inf }
 0x9c4   :  { %1098 = vmax.xlane.f32.xlu1 %v1097_v4 }
 0x9d5   :  { %1166 = vrot.lane.b32.xlu1 %v1717_v32, %s1590_s13 }
 0xa0a   :  { %v1108_v41 = vpop.xlane.xlu0 %1107 }
 0xa51   :  { %v1099_v53 = vpop.xlane.xlu1 %1098 }
 0xa52   :  { %v1101_v5 = vsub.f32 %v1093_v3, %v1099_v53  ;;  %v1354_v3 = vld [vmem:[%s1951_s10] ss:$0 sm:$0xff] }
 0xa54   :  { %v1104_v6 = vmul.f32 1.442695, %v1101_v5 }
 0xa55   :  { %v1167_v7 = vpop.permute.xlu1 %1166 }
 0xa56   :  { %1572 = vpow2.f32 %v1104_v6  ;;  %v1172_v56 = vsel %vm295_vm3, %v1167_v7, 0 }
 0xa57   :  { %1526 = vmatpush3.bf16.msra.mxu0 %v1172_v56  ;;  %1574 = vrcp.f32 %v1108_v41 }
 0xa60   :  { %v1573_v8 = vpop.eup %1572 }
 0xa61   :  { %v1109_v9 = vsel %vm166_vm2, %v1573_v8, 0.0  ;;  %v1575_v10 = vpop.eup %1574 }
 0xa62   :  { %1110 = vadd.xlane.f32.xlu0 %v1109_v9  ;;  %v1114_v32 = vmul.f32 %v1575_v10, %v1571_v52 }
 0xa64   :  { %v1116_v14 = vpack.c.bf16 %v1114_v32, %v1114_v32 }
 0xa78   :  { %1118 = vrot.lane.b32.xlu0 %v1715_v27, %s1590_s13 }
 0xaef   :  { %v1111_v11 = vpop.xlane.xlu0 %1110 }
 0xaf0   :  { %1576 = vrcp.f32 %v1111_v11 }
 0xaf3   :  { %v1119_v12 = vpop.permute.xlu0 %1118 }
 0xaf4   :  { %v1124_v13 = vsel %vm295_vm3, %v1119_v12, 0 }
 0xaf5   :  { %1520 = vmatpush3.bf16.msra.mxu1 %v1124_v13 }
 0xaf6   :  { %1531 = vmatprep.subr.bf16.mxu1 %v1582_v0 }
 0xaf8   :  { %1522 = vmatmul.mubr.msk.bf16.vlgmr.msra.gmra.mrb[36].mxu1 %vm166_vm2, %v1116_v14 }
 0xaf9   :  { %1533 = vmatprep.mubr.msk.bf16.mxu1 %vm1583_vm0, %v1582_v0  ;;  %1532 = vmatpush3.bf16.msra.mxu1 %v1221_v22 }
 0xafa   :  { %v1577_v17 = vpop.eup %1576 }
 0xafb   :  { %v1115_v27 = vmul.f32 %v1577_v17, %v1573_v8 }
 0xafd   :  { %v1117_v18 = vpack.c.bf16 %v1115_v27, %v1115_v27 }
 0xaff   :  { %1528 = vmatmul.mubr.msk.bf16.vlgmr.msra.gmra.mrb[40].mxu0 %vm166_vm2, %v1117_v18 }
 0xbcb   :  { %v1160_v23 = vpop.f32.mrb[36].mxu1 }
 0xbcc   :  { %v1523_v36 = vpop.f32.mrb[37].mxu1 }
 0xbcd   :  { %v1163_v21 = vpop.f32.mrb[38].mxu1 }
 0xbce   :  { %v1524_v24 = vpop.f32.mrb[39].mxu1 }
 0xbd2   :  { %v1208_v25 = vpop.f32.mrb[40].mxu0 }
 0xbd3   :  { %v1215_v26 = vpack.c.bf16 %v1208_v25, %v1160_v23  ;;  %v1529_v0 = vpop.f32.mrb[41].mxu0 }
 0xbd4   :  { %v1211_v28 = vpop.f32.mrb[42].mxu0 }
 0xbd5   :  { %v1530_v29 = vpop.f32.mrb[43].mxu0  ;;  %1534 = vmatmul.mubr.msk.bf16.vlgmr.msra.gmra.mrb[40].mxu1 %vm166_vm2, %v1215_v26 }
 0xca8   :  { %v1257_v30 = vpop.f32.mrb[40].mxu1 }
 0xca9   :  { %v1264_v33 = vadd.f32 %v1257_v30, %v988_v57  ;;  %v1535_v34 = vpop.f32.mrb[41].mxu1 }
 0xcaa   :  { %v1260_v35 = vpop.f32.mrb[42].mxu1 }
 0xcab   :  { %v1273_v37 = vadd.f32 %v1352_v31, %v1264_v33  ;;  %v1265_v39 = vadd.f32 %v1260_v35, %v989_v59  ;;  %v1536_v40 = vpop.f32.mrb[43].mxu1 }
 0xcad   :  { %v1274_v42 = vadd.f32 %v1352_v31, %v1265_v39  ;;  %v1275_v43 = vadd.f32 %v1273_v37, %v1691_v15 }
 0xcaf   :  { %v1277_v44 = vsel %vm57_vm1, %v1275_v43, 0.0  ;;  %v1276_v45 = vadd.f32 %v1274_v42, %v1696_v16 }
 0xcb0   :  { %1278 = vadd.xlane.f32.xlu1 %v1277_v44 }
 0xcb1   :  { %v1280_v46 = vsel %vm57_vm1, %v1276_v45, 0.0 }
 0xcb2   :  { %1281 = vadd.xlane.f32.xlu0 %v1280_v46 }
 0xd3d   :  { %v1279_v47 = vpop.xlane.xlu1 %1278 }
 0xd3e   :  { %v1284_v48 = vmul.f32 0.03125, %v1279_v47 }
 0xd3f   :  { %v1282_v49 = vpop.xlane.xlu0 %1281 }
 0xd40   :  { %v1286_v50 = vsub.f32 %v1275_v43, %v1284_v48  ;;  %v1285_v51 = vmul.f32 0.03125, %v1282_v49 }
 0xd42   :  { %v1287_v52 = vsub.f32 %v1276_v45, %v1285_v51  ;;  %v1288_v54 = vmul.f32 %v1286_v50, %v1286_v50 }
 0xd44   :  { %v1290_v55 = vsel %vm57_vm1, %v1288_v54, 0.0  ;;  %v1289_v57 = vmul.f32 %v1287_v52, %v1287_v52 }
 0xd45   :  { %1291 = vadd.xlane.f32.xlu0 %v1290_v55 }
 0xd46   :  { %v1293_v15 = vsel %vm57_vm1, %v1289_v57, 0.0 }
 0xd47   :  { %1294 = vadd.xlane.f32.xlu1 %v1293_v15 }
 0xdd2   :  { %v1292_v58 = vpop.xlane.xlu0 %1291 }
 0xdd3   :  { %v1296_v16 = vmul.f32 0.03125, %v1292_v58 }
 0xdd4   :  { %v1295_v38 = vpop.xlane.xlu1 %1294 }
 0xdd5   :  { %v1298_v59 = vadd.f32 1e-05, %v1296_v16  ;;  %v1297_v60 = vmul.f32 0.03125, %v1295_v38 }
 0xdd7   :  { %1578 = vrsqrt.f32 %v1298_v59  ;;  %v1299_v61 = vadd.f32 1e-05, %v1297_v60 }
 0xdd9   :  { %1580 = vrsqrt.f32 %v1299_v61 }
 0xde1   :  { %v1579_v62 = vpop.eup %1578 }
 0xde2   :  { %v1302_v1 = vmul.f32 %v1579_v62, %v1286_v50 }
 0xde3   :  { %v1581_v2 = vpop.eup %1580 }
 0xde4   :  { %v1311_v4 = vmul.f32 %v1353_v63, %v1302_v1  ;;  %v1303_v53 = vmul.f32 %v1581_v2, %v1287_v52 }
 0xde6   :  { %v1320_v5 = vadd.f32 %v1354_v3, %v1311_v4  ;;  %v1312_v6 = vmul.f32 %v1353_v63, %v1303_v53 }
 0xde8   :  { %1322 = vst.msk [vmem:[%s1952_s11] sm:$0xff] %vm57_vm1, %v1320_v5  ;;  %v1321_v7 = vadd.f32 %v1354_v3, %v1312_v6 }
 0xdea   :  { %1323 = vst.msk [vmem:[%s1952_s11 + $0x8] sm:$0xff] %vm57_vm1, %v1321_v7 }

</bundles_post_ra>
